<compile_context>
chip_gen: v6e
topology: v6e:2x2x1
jax: 0.10.0
libtpu: 0.0.40
codegen_flags: <defaults>
</compile_context>

<pallas_src>
import jax
import jax.numpy as jnp
from jax.experimental import pallas as pl
from jax.experimental.pallas import tpu as pltpu

EPS = 1e-5


def _round_up(x, m):
    return (x + m - 1) // m * m


def critic_kernel(scale_ref, shift_ref,
                  state_ref, action_ref,
                  w1t_ref, b1_ref,
                  w2at_ref, w2bt_ref, b2_ref,
                  w3t_ref, b3_ref,
                  out_ref):
    # ---- BatchNorm1d, folded to per-feature affine (stats precomputed in wrapper) ----
    norm0 = state_ref[...] * scale_ref[...] + shift_ref[...]          # (TB, S) f32

    # ---- layer1 + ReLU  (bf16 MXU inputs, f32 accumulate) ----
    h1 = jnp.dot(norm0.astype(jnp.bfloat16), w1t_ref[...],
                 preferred_element_type=jnp.float32)
    h1 = jnp.maximum(h1 + b1_ref[...], 0.0)                           # (TB, H1) f32

    # ---- cat((h1, action)) -> layer2 + ReLU  (split-weight formulation) ----
    h2 = (jnp.dot(h1.astype(jnp.bfloat16), w2at_ref[...],
                  preferred_element_type=jnp.float32)
          + jnp.dot(action_ref[...].astype(jnp.bfloat16), w2bt_ref[...],
                    preferred_element_type=jnp.float32))
    h2 = jnp.maximum(h2 + b2_ref[...], 0.0)                           # (TB, H2) f32

    # ---- layer3 (no activation) ----
    out = jnp.dot(h2.astype(jnp.bfloat16), w3t_ref[...],
                  preferred_element_type=jnp.float32) + b3_ref[...]
    out_ref[...] = out.astype(out_ref.dtype)                          # (TB, A)


def critic_forward(state, action, params, *, block_b=256):
    """state: (B, S), action: (B, A) -> (B, A) Q-values (training-mode BatchNorm)."""
    B, S = state.shape
    A = action.shape[1]
    gamma, beta, w1t, b1, w2at, w2bt, b2, w3t, b3 = params
    H1 = w1t.shape[1]
    H2 = w2at.shape[1]

    state = state.astype(jnp.float32)
    action = action.astype(jnp.float32)

    # BatchNorm1d training-mode statistics over the FULL batch (biased variance),
    # folded into a per-feature scale/shift so the batch axis can be grid-tiled.
    mean = jnp.mean(state, axis=0, keepdims=True)                 # (1, S)
    var = jnp.mean(jnp.square(state - mean), axis=0, keepdims=True)
    scale = gamma * jax.lax.rsqrt(var + EPS)                      # (1, S)
    shift = beta - mean * scale                                   # (1, S)

    # Choose a sublane-aligned batch tile and pad the batch to a multiple of it.
    TB = min(block_b, _round_up(B, 8))
    B_pad = _round_up(B, TB)
    if B_pad != B:
        state = jnp.pad(state, ((0, B_pad - B), (0, 0)))
        action = jnp.pad(action, ((0, B_pad - B), (0, 0)))
    n_tiles = B_pad // TB

    # bf16 weights: half the HBM->VMEM DMA bytes, native-rate MXU (f32 accumulate in-kernel).
    w1t_b = w1t.astype(jnp.bfloat16)
    w2at_b = w2at.astype(jnp.bfloat16)
    w2bt_b = w2bt.astype(jnp.bfloat16)
    w3t_b = w3t.astype(jnp.bfloat16)

    batch_spec = lambda cols: pl.BlockSpec((TB, cols), lambda i: (i, 0))
    const_spec = lambda shp: pl.BlockSpec(shp, lambda i: (0, 0))   # VMEM-resident across tiles

    out = pl.pallas_call(
        critic_kernel,
        out_shape=jax.ShapeDtypeStruct((B_pad, A), jnp.float32),
        grid=(n_tiles,),
        in_specs=[
            const_spec((1, S)),     # BN scale
            const_spec((1, S)),     # BN shift
            batch_spec(S),          # state tile
            batch_spec(A),          # action tile
            const_spec((S, H1)),    # W1^T (bf16)
            const_spec((1, H1)),    # b1
            const_spec((H1, H2)),   # W2a^T (bf16, hidden part of cat)
            const_spec((A, H2)),    # W2b^T (bf16, action part of cat)
            const_spec((1, H2)),    # b2
            const_spec((H2, A)),    # W3^T (bf16)
            const_spec((1, A)),     # b3
        ],
        out_specs=batch_spec(A),
        compiler_params=pltpu.CompilerParams(
            dimension_semantics=("parallel",)),
    )(scale, shift, state, action,
      w1t_b, b1, w2at_b, w2bt_b, b2, w3t_b, b3)

    return out[:B]


def init_params(key, state_space, action_space, hidden1, hidden2):
    """Deterministic synthetic init mirroring the torch module's shapes/ranges."""
    ks = jax.random.split(key, 6)
    lim1 = 1.0 / jnp.sqrt(hidden1)
    lim2 = 1.0 / jnp.sqrt(hidden2)

    # nn.Linear stores weight as (out, in); we build the transposed version directly.
    w1t = jax.random.uniform(ks[0], (state_space, hidden1), jnp.float32, -lim1, lim1)
    b1 = jax.random.uniform(ks[1], (1, hidden1), jnp.float32, -lim1, lim1)

    w2t_full = jax.random.uniform(ks[2], (hidden1 + action_space, hidden2),
                                  jnp.float32, -lim2, lim2)
    w2at = w2t_full[:hidden1]          # multiplies output1
    w2bt = w2t_full[hidden1:]          # multiplies action
    b2 = jax.random.uniform(ks[3], (1, hidden2), jnp.float32, -lim2, lim2)

    w3t = jax.random.uniform(ks[4], (hidden2, action_space), jnp.float32, -0.003, 0.003)
    b3 = jax.random.uniform(ks[5], (1, action_space), jnp.float32, -0.003, 0.003)

    gamma = jnp.ones((1, state_space), jnp.float32)   # BatchNorm1d weight
    beta = jnp.zeros((1, state_space), jnp.float32)   # BatchNorm1d bias
    return (gamma, beta, w1t, b1, w2at, w2bt, b2, w3t, b3)


def critic_ref(state, action, params):
    """Pure-JAX f32 reference (original module semantics, training-mode BN)."""
    (gamma, beta, w1t, b1, w2at, w2bt, b2, w3t, b3) = params
    mean = jnp.mean(state, axis=0, keepdims=True)
    var = jnp.mean((state - mean) ** 2, axis=0, keepdims=True)
    norm0 = (state - mean) / jnp.sqrt(var + EPS) * gamma + beta
    h1 = jax.nn.relu(norm0 @ w1t + b1)
    h2 = jax.nn.relu(h1 @ w2at + action @ w2bt + b2)
    return h2 @ w3t + b3


if __name__ == "__main__":
    S, A = 32, 8
    H1, H2 = 512, 256          # module defaults
    B = 128                    # fills MXU rows (was 8 -> <6% MXU row utilization)

    key = jax.random.PRNGKey(0)
    k_state, k_action, k_params = jax.random.split(key, 3)
    params = init_params(k_params, S, A, H1, H2)

    state = jax.random.normal(k_state, (B, S), jnp.float32)
    action = jax.random.normal(k_action, (B, A), jnp.float32)

    out = jax.block_until_ready(critic_forward(state, action, params))
    ref = critic_ref(state, action, params)
    assert out.shape == (B, A)
    # bf16 MXU inputs -> loosened tolerance vs the f32 reference.
    assert jnp.allclose(out, ref, atol=2e-3, rtol=2e-2), "Pallas output mismatch vs reference"

    # Also exercise the non-multiple-of-8 batch (padding) path.
    B2 = 12
    state2 = jax.random.normal(jax.random.PRNGKey(1), (B2, S), jnp.float32)
    action2 = jax.random.normal(jax.random.PRNGKey(2), (B2, A), jnp.float32)
    out2 = jax.block_until_ready(critic_forward(state2, action2, params))
    ref2 = critic_ref(state2, action2, params)
    assert out2.shape == (B2, A)
    assert jnp.allclose(out2, ref2, atol=2e-3, rtol=2e-2), "Padded-batch mismatch vs reference"

    print("KERNEL_OK")
</pallas_src>

<mosaic_0001>
module attributes {stable_mosaic.version = 11 : i64} {
  func.func @critic_kernel(%arg0: i32, %arg1: memref<1x32xf32, #tpu.memory_space<vmem>>, %arg2: memref<1x32xf32, #tpu.memory_space<vmem>>, %arg3: memref<128x32xf32, #tpu.memory_space<vmem>>, %arg4: memref<128x8xf32, #tpu.memory_space<vmem>>, %arg5: memref<32x512xbf16, #tpu.memory_space<vmem>>, %arg6: memref<1x512xf32, #tpu.memory_space<vmem>>, %arg7: memref<512x256xbf16, #tpu.memory_space<vmem>>, %arg8: memref<8x256xbf16, #tpu.memory_space<vmem>>, %arg9: memref<1x256xf32, #tpu.memory_space<vmem>>, %arg10: memref<256x8xbf16, #tpu.memory_space<vmem>>, %arg11: memref<1x8xf32, #tpu.memory_space<vmem>>, %arg12: memref<128x8xf32, #tpu.memory_space<vmem>>) attributes {dimension_semantics = [#tpu.dimension_semantics<parallel>], iteration_bounds = array<i64: 1>, scalar_prefetch = 0 : i64, scratch_operands = 0 : i64, tpu.core_type = #tpu.core_type<tc>, window_params = [{pipeline_mode = #tpu.pipeline_mode<synchronous>, transform_indices = @transform_0, window_bounds = array<i64: 1, 32>}, {pipeline_mode = #tpu.pipeline_mode<synchronous>, transform_indices = @transform_1, window_bounds = array<i64: 1, 32>}, {transform_indices = @transform_2, window_bounds = array<i64: 128, 32>}, {transform_indices = @transform_3, window_bounds = array<i64: 128, 8>}, {pipeline_mode = #tpu.pipeline_mode<synchronous>, transform_indices = @transform_4, window_bounds = array<i64: 32, 512>}, {pipeline_mode = #tpu.pipeline_mode<synchronous>, transform_indices = @transform_5, window_bounds = array<i64: 1, 512>}, {pipeline_mode = #tpu.pipeline_mode<synchronous>, transform_indices = @transform_6, window_bounds = array<i64: 512, 256>}, {pipeline_mode = #tpu.pipeline_mode<synchronous>, transform_indices = @transform_7, window_bounds = array<i64: 8, 256>}, {pipeline_mode = #tpu.pipeline_mode<synchronous>, transform_indices = @transform_8, window_bounds = array<i64: 1, 256>}, {pipeline_mode = #tpu.pipeline_mode<synchronous>, transform_indices = @transform_9, window_bounds = array<i64: 256, 8>}, {pipeline_mode = #tpu.pipeline_mode<synchronous>, transform_indices = @transform_10, window_bounds = array<i64: 1, 8>}, {transform_indices = @transform_11, window_bounds = array<i64: 128, 8>}]} {
    %c0 = arith.constant 0 : index
    %c0_0 = arith.constant 0 : index
    %0 = vector.load %arg3[%c0, %c0_0] : memref<128x32xf32, #tpu.memory_space<vmem>>, vector<128x32xf32>
    %c0_1 = arith.constant 0 : index
    %c0_2 = arith.constant 0 : index
    %1 = vector.load %arg1[%c0_1, %c0_2] : memref<1x32xf32, #tpu.memory_space<vmem>>, vector<1x32xf32>
    %2 = vector.broadcast %1 : vector<1x32xf32> to vector<128x32xf32>
    %3 = arith.mulf %0, %2 : vector<128x32xf32>
    %c0_3 = arith.constant 0 : index
    %c0_4 = arith.constant 0 : index
    %4 = vector.load %arg2[%c0_3, %c0_4] : memref<1x32xf32, #tpu.memory_space<vmem>>, vector<1x32xf32>
    %5 = vector.broadcast %4 : vector<1x32xf32> to vector<128x32xf32>
    %6 = arith.addf %3, %5 : vector<128x32xf32>
    %7 = arith.truncf %6 : vector<128x32xf32> to vector<128x32xbf16>
    %c0_5 = arith.constant 0 : index
    %c0_6 = arith.constant 0 : index
    %8 = vector.load %arg5[%c0_5, %c0_6] : memref<32x512xbf16, #tpu.memory_space<vmem>>, vector<32x512xbf16>
    %cst = arith.constant dense<0.000000e+00> : vector<128x512xf32>
    %9 = tpu.matmul %7, %8, %cst {dimension_numbers = #tpu.dot_dimension_numbers<[1], [0], [0], [1], [0, 0, 1, 1], [], []>} : vector<128x32xbf16>, vector<32x512xbf16>, vector<128x512xf32> -> vector<128x512xf32>
    %c0_7 = arith.constant 0 : index
    %c0_8 = arith.constant 0 : index
    %10 = vector.load %arg6[%c0_7, %c0_8] : memref<1x512xf32, #tpu.memory_space<vmem>>, vector<1x512xf32>
    %11 = vector.broadcast %10 : vector<1x512xf32> to vector<128x512xf32>
    %12 = arith.addf %9, %11 : vector<128x512xf32>
    %cst_9 = arith.constant 0.000000e+00 : f32
    %13 = vector.broadcast %cst_9 : f32 to vector<128x512xf32>
    %14 = arith.maximumf %12, %13 : vector<128x512xf32>
    %15 = arith.truncf %14 : vector<128x512xf32> to vector<128x512xbf16>
    %c0_10 = arith.constant 0 : index
    %c0_11 = arith.constant 0 : index
    %16 = vector.load %arg7[%c0_10, %c0_11] : memref<512x256xbf16, #tpu.memory_space<vmem>>, vector<512x256xbf16>
    %cst_12 = arith.constant dense<0.000000e+00> : vector<128x256xf32>
    %17 = tpu.matmul %15, %16, %cst_12 {dimension_numbers = #tpu.dot_dimension_numbers<[1], [0], [0], [1], [0, 0, 1, 1], [], []>} : vector<128x512xbf16>, vector<512x256xbf16>, vector<128x256xf32> -> vector<128x256xf32>
    %c0_13 = arith.constant 0 : index
    %c0_14 = arith.constant 0 : index
    %18 = vector.load %arg4[%c0_13, %c0_14] : memref<128x8xf32, #tpu.memory_space<vmem>>, vector<128x8xf32>
    %19 = arith.truncf %18 : vector<128x8xf32> to vector<128x8xbf16>
    %c0_15 = arith.constant 0 : index
    %c0_16 = arith.constant 0 : index
    %20 = vector.load %arg8[%c0_15, %c0_16] : memref<8x256xbf16, #tpu.memory_space<vmem>>, vector<8x256xbf16>
    %cst_17 = arith.constant dense<0.000000e+00> : vector<128x256xf32>
    %21 = tpu.matmul %19, %20, %cst_17 {dimension_numbers = #tpu.dot_dimension_numbers<[1], [0], [0], [1], [0, 0, 1, 1], [], []>} : vector<128x8xbf16>, vector<8x256xbf16>, vector<128x256xf32> -> vector<128x256xf32>
    %22 = arith.addf %17, %21 : vector<128x256xf32>
    %c0_18 = arith.constant 0 : index
    %c0_19 = arith.constant 0 : index
    %23 = vector.load %arg9[%c0_18, %c0_19] : memref<1x256xf32, #tpu.memory_space<vmem>>, vector<1x256xf32>
    %24 = vector.broadcast %23 : vector<1x256xf32> to vector<128x256xf32>
    %25 = arith.addf %22, %24 : vector<128x256xf32>
    %cst_20 = arith.constant 0.000000e+00 : f32
    %26 = vector.broadcast %cst_20 : f32 to vector<128x256xf32>
    %27 = arith.maximumf %25, %26 : vector<128x256xf32>
    %28 = arith.truncf %27 : vector<128x256xf32> to vector<128x256xbf16>
    %c0_21 = arith.constant 0 : index
    %c0_22 = arith.constant 0 : index
    %29 = vector.load %arg10[%c0_21, %c0_22] : memref<256x8xbf16, #tpu.memory_space<vmem>>, vector<256x8xbf16>
    %cst_23 = arith.constant dense<0.000000e+00> : vector<128x8xf32>
    %30 = tpu.matmul %28, %29, %cst_23 {dimension_numbers = #tpu.dot_dimension_numbers<[1], [0], [0], [1], [0, 0, 1, 1], [], []>} : vector<128x256xbf16>, vector<256x8xbf16>, vector<128x8xf32> -> vector<128x8xf32>
    %c0_24 = arith.constant 0 : index
    %c0_25 = arith.constant 0 : index
    %31 = vector.load %arg11[%c0_24, %c0_25] : memref<1x8xf32, #tpu.memory_space<vmem>>, vector<1x8xf32>
    %32 = vector.broadcast %31 : vector<1x8xf32> to vector<128x8xf32>
    %33 = arith.addf %30, %32 : vector<128x8xf32>
    %c0_26 = arith.constant 0 : index
    %c0_27 = arith.constant 0 : index
    %34 = vector.load %arg12[%c0_26, %c0_27] : memref<128x8xf32, #tpu.memory_space<vmem>>, vector<128x8xf32>
    tpu.vector_store %arg12[%c0_26, %c0_27], %33 {strides = array<i32>} : memref<128x8xf32, #tpu.memory_space<vmem>>, vector<128x8xf32>,
    return
  }
  func.func @transform_0(%arg0: i32) -> (i32, i32) {
    %c0_i32 = arith.constant 0 : i32
    %c0_i32_0 = arith.constant 0 : i32
    %c0_i32_1 = arith.constant 0 : i32
    return %c0_i32, %c0_i32_0 : i32, i32
  }
  func.func @transform_1(%arg0: i32) -> (i32, i32) {
    %c0_i32 = arith.constant 0 : i32
    %c0_i32_0 = arith.constant 0 : i32
    %c0_i32_1 = arith.constant 0 : i32
    return %c0_i32, %c0_i32_0 : i32, i32
  }
  func.func @transform_2(%arg0: i32) -> (i32, i32) {
    %c0_i32 = arith.constant 0 : i32
    %c0_i32_0 = arith.constant 0 : i32
    return %arg0, %c0_i32 : i32, i32
  }
  func.func @transform_3(%arg0: i32) -> (i32, i32) {
    %c0_i32 = arith.constant 0 : i32
    %c0_i32_0 = arith.constant 0 : i32
    return %arg0, %c0_i32 : i32, i32
  }
  func.func @transform_4(%arg0: i32) -> (i32, i32) {
    %c0_i32 = arith.constant 0 : i32
    %c0_i32_0 = arith.constant 0 : i32
    %c0_i32_1 = arith.constant 0 : i32
    return %c0_i32, %c0_i32_0 : i32, i32
  }
  func.func @transform_5(%arg0: i32) -> (i32, i32) {
    %c0_i32 = arith.constant 0 : i32
    %c0_i32_0 = arith.constant 0 : i32
    %c0_i32_1 = arith.constant 0 : i32
    return %c0_i32, %c0_i32_0 : i32, i32
  }
  func.func @transform_6(%arg0: i32) -> (i32, i32) {
    %c0_i32 = arith.constant 0 : i32
    %c0_i32_0 = arith.constant 0 : i32
    %c0_i32_1 = arith.constant 0 : i32
    return %c0_i32, %c0_i32_0 : i32, i32
  }
  func.func @transform_7(%arg0: i32) -> (i32, i32) {
    %c0_i32 = arith.constant 0 : i32
    %c0_i32_0 = arith.constant 0 : i32
    %c0_i32_1 = arith.constant 0 : i32
    return %c0_i32, %c0_i32_0 : i32, i32
  }
  func.func @transform_8(%arg0: i32) -> (i32, i32) {
    %c0_i32 = arith.constant 0 : i32
    %c0_i32_0 = arith.constant 0 : i32
    %c0_i32_1 = arith.constant 0 : i32
    return %c0_i32, %c0_i32_0 : i32, i32
  }
  func.func @transform_9(%arg0: i32) -> (i32, i32) {
    %c0_i32 = arith.constant 0 : i32
    %c0_i32_0 = arith.constant 0 : i32
    %c0_i32_1 = arith.constant 0 : i32
    return %c0_i32, %c0_i32_0 : i32, i32
  }
  func.func @transform_10(%arg0: i32) -> (i32, i32) {
    %c0_i32 = arith.constant 0 : i32
    %c0_i32_0 = arith.constant 0 : i32
    %c0_i32_1 = arith.constant 0 : i32
    return %c0_i32, %c0_i32_0 : i32, i32
  }
  func.func @transform_11(%arg0: i32) -> (i32, i32) {
    %c0_i32 = arith.constant 0 : i32
    %c0_i32_0 = arith.constant 0 : i32
    return %arg0, %c0_i32 : i32, i32
  }
}

</mosaic_0001>

<bundles_post_ra>
// kernel: tpu_custom_call.1
= control target key start
LH: loop header
LB: loop body
LE: loop exit
PB: predicated region body
PF: predicated region fallthrough
CT: control target
= control target key end

     0   :  { %16 = vsyncpa [#allocation3], 0  ;;  %s2004_s17 = smov [#allocation2]   ;;  %s2620_s0 = inlined_call_operand.vmem [shape: f32[1,32], index: 0, kind: input, shape index: {}]   ;;  %s2621_s1 = inlined_call_operand.vmem [shape: f32[1,32], index: 1, kind: input, shape index: {}]   ;;  %s2622_s2 = inlined_call_operand.vmem [shape: f32[128,32], index: 2, kind: input, shape index: {}]   ;;  %s2623_s3 = inlined_call_operand.vmem [shape: f32[128,8], index: 3, kind: input, shape index: {}]   ;;  %s2624_s4 = inlined_call_operand.vmem [shape: bf16[32,512], index: 4, kind: input, shape index: {}]   ;;  %s2625_s5 = inlined_call_operand.vmem [shape: f32[1,512], index: 5, kind: input, shape index: {}]   ;;  %s2626_s6 = inlined_call_operand.hbm [shape: bf16[512,256], index: 6, kind: input, shape index: {}]   ;;  %s2627_s7 = inlined_call_operand.vmem [shape: bf16[8,256], index: 7, kind: input, shape index: {}]   ;;  %s2628_s8 = inlined_call_operand.vmem [shape: f32[1,256], index: 8, kind: input, shape index: {}]   ;;  %s2629_s9 = inlined_call_operand.vmem [shape: bf16[256,8], index: 9, kind: input, shape index: {}]   ;;  %s2630_s10 = inlined_call_operand.vmem [shape: f32[1,8], index: 10, kind: input, shape index: {}]   ;;  %s2631_s11 = inlined_call_operand.vmem [shape: f32[128,8], index: 11, kind: output, shape index: {}]  }
   0x1   :  { %s34_s18 = sshll.u32 %s2004_s17, 4  ;;  %s35_s18 = int_to_ptr.vmem [resolvable:$true] %s34_s18 }
   0x2   :  { %s1990_s19 = scalar_lea.vmem %s35_s18, 8192  ;;  %p1995_p1 = scmp.lt.s32.totalorder %s35_s18, %s35_s18 }
   0x3   :  { %p1991_p0 = scmp.ne.s32.totalorder %s35_s18, %s1990_s19  ;;  %p1996_p2 = scmp.lt.s32.totalorder %s1990_s19, %s1990_s19 }
   0x5   :  { %p1997_p3 = por %p1996_p2, %p1995_p1 }
   0x7   :  { %p1998_p4 = pnand %p1997_p3, %p1991_p0 }
   0x9   :  { %2001 = shalt.err (!%p1998_p4)
}
   0xa   :  { %s2005_s20 = smov 128   ;;  %s2006_s21 = smov 8  }
   0xb   :  { %40 = dma.hbm_to_vmem [thread:$0]  %s2626_s6, 8192, %s35_s18, [#allocation3], %s2005_s20, %s2005_s20, %s2006_s21  }
   0xc   :  { %2002 = dma.done.wait [#allocation3], 8192  }
   0xd   :  { %2003 = vsyncadd [#allocation3], 4294959104  ;;  %v2007_v0 = vmov 0   ;;  %v1856_v1 = vld [vmem:[%s2624_s4 + $0x24] ss:$16 sps:$4 sm:$0xff]   ;;  %v54_v10 = vld [vmem:[%s2622_s2 + $0x8] sm:$0xff] }
   0xe   :  { %250 = vmatprep.mubr.bf16.mxu0 %v2007_v0  ;;  %363 = vmatprep.mubr.bf16.mxu1 %v2007_v0  ;;  %v1858_v2 = vld [vmem:[%s2624_s4 + $0x2c] ss:$16 sps:$4 sm:$0xff]   ;;  %v1860_v3 = vld [vmem:[%s2624_s4 + $0x20] ss:$16 sps:$4 sm:$0xff]   ;;  %v1861_v4 = vld [vmem:[%s2624_s4 + $0x28] ss:$16 sps:$4 sm:$0xff]  }
   0xf   :  { %230 = vmatprep.subr.bf16.mxu0 %v1856_v1  ;;  %343 = vmatprep.subr.bf16.mxu1 %v1858_v2  ;;  %v1862_v5 = vld [vmem:[%s2624_s4 + $0x4] ss:$16 sps:$4 sm:$0xff]   ;;  %v1864_v6 = vld [vmem:[%s2624_s4 + $0xc] ss:$16 sps:$4 sm:$0xff]   ;;  %v1866_v7 = vld [vmem:[%s2624_s4] ss:$16 sps:$4 sm:$0xff]  }
  0x10   :  { %231 = vmatpush1.bf16.msra.mxu0 %v1860_v3  ;;  %344 = vmatpush1.bf16.msra.mxu1 %v1861_v4  ;;  %v1867_v8 = vld [vmem:[%s2624_s4 + $0x8] ss:$16 sps:$4 sm:$0xff]   ;;  %v53_v9 = vld [vmem:[%s2622_s2] sm:$0xff]  ;;  %v55_v13 = vld [vmem:[%s2622_s2 + $0x10] sm:$0xff]  ;;  %vm193_vm0 = vcmask 261120   ;;  %vm659_vm1 = vcmask 1043456  }
  0x11   :  { %232 = vmatprep.subr.bf16.mxu0 %v1862_v5  ;;  %345 = vmatprep.subr.bf16.mxu1 %v1864_v6  ;;  %v2106_v11 = vld [vmem:[%s2620_s0] ss:$0 sm:$0xff]  ;;  %v56_v16 = vld [vmem:[%s2622_s2 + $0x18] sm:$0xff]  ;;  %v58_v28 = vld [vmem:[%s2622_s2 + $0x28] sm:$0xff]  ;;  %vm634_vm2 = vcmask 64512  }
  0x12   :  { %v2111_v12 = vld [vmem:[%s2621_s1] ss:$0 sm:$0xff]  ;;  %v76_v14 = vmul.f32 %v2106_v11, %v53_v9  ;;  %v77_v15 = vmul.f32 %v2106_v11, %v54_v10  ;;  %v78_v19 = vmul.f32 %v2106_v11, %v55_v13  ;;  %v79_v20 = vmul.f32 %v2106_v11, %v56_v16  ;;  %v1870_v25 = vld [vmem:[#allocation2 + $0x70] ss:$8 sps:$4 sm:$0xff]   ;;  %v1872_v26 = vld [vmem:[#allocation2 + $0x74] ss:$8 sps:$4 sm:$0xff]  }
  0x13   :  { %v628_v22 = vld [vmem:[%s2627_s7] sm:$0xff]  ;;  %v1875_v31 = vld [vmem:[#allocation2 + $0x174] ss:$8 sps:$4 sm:$0xff]   ;;  %v81_v36 = vmul.f32 %v2106_v11, %v58_v28  ;;  %v1882_v39 = vld [vmem:[#allocation2 + $0x50] ss:$8 sps:$4 sm:$0xff]  }
  0x14   :  { %233 = vmatpush1.bf16.msra.mxu0 %v1866_v7  ;;  %346 = vmatpush1.bf16.msra.mxu1 %v1867_v8  ;;  %v99_v17 = vadd.f32 %v2111_v12, %v76_v14  ;;  %v100_v18 = vadd.f32 %v2111_v12, %v77_v15  ;;  %v101_v23 = vadd.f32 %v2111_v12, %v78_v19  ;;  %v57_v27 = vld [vmem:[%s2622_s2 + $0x20] sm:$0xff]  ;;  %v1884_v38 = vld [vmem:[#allocation2 + $0x54] ss:$8 sps:$4 sm:$0xff]   ;;  %v1894_v51 = vld [vmem:[#allocation2 + $0x30] ss:$8 sps:$4 sm:$0xff]  }
  0x15   :  { %v102_v24 = vadd.f32 %v2111_v12, %v79_v20  ;;  %1099 = vmatprep.subr.bf16.mxu1 %v1872_v26  ;;  %v1697_v29 = vcombine.high %v628_v22, %v628_v22  ;;  %v1696_v30 = vcombine.low %v628_v22, %v628_v22  ;;  %v1876_v32 = vld [vmem:[#allocation2 + $0x60] ss:$8 sps:$4 sm:$0xff]   ;;  %v1878_v33 = vld [vmem:[#allocation2 + $0x64] ss:$8 sps:$4 sm:$0xff]   ;;  %v80_v35 = vmul.f32 %v2106_v11, %v57_v27  ;;  %v59_v42 = vld [vmem:[%s2622_s2 + $0x30] sm:$0xff] }
  0x16   :  { %v115_v21 = vpack.c.bf16 %v100_v18, %v99_v17  ;;  %v104_v41 = vadd.f32 %v2111_v12, %v81_v36  ;;  %v60_v43 = vld [vmem:[%s2622_s2 + $0x38] sm:$0xff]  ;;  %v1890_v44 = vld [vmem:[#allocation2 + $0x44] ss:$8 sps:$4 sm:$0xff]   ;;  %v1888_v45 = vld [vmem:[#allocation2 + $0x40] ss:$8 sps:$4 sm:$0xff]   ;;  %v82_v47 = vmul.f32 %v2106_v11, %v59_v42 }
  0x17   :  { %v116_v34 = vpack.c.bf16 %v102_v24, %v101_v23  ;;  %1698 = vmatprep.subr.msk.bf16.mxu0 %vm659_vm1, %v1697_v29  ;;  %v661_v37 = vsel %vm659_vm1, %v1696_v30, 0  ;;  %v103_v40 = vadd.f32 %v2111_v12, %v80_v35  ;;  %v83_v48 = vmul.f32 %v2106_v11, %v60_v43  ;;  %v1896_v49 = vld [vmem:[#allocation2 + $0x34] ss:$8 sps:$4 sm:$0xff]   ;;  %v61_v50 = vld [vmem:[%s2622_s2 + $0x40] sm:$0xff]  ;;  %v62_v55 = vld [vmem:[%s2622_s2 + $0x48] sm:$0xff] }
  0x18   :  { %1680 = vmatmul.mubr.msk.bf16.vlgmr.msra.gmra.mxu0 %vm193_vm0, %v115_v21  ;;  %1688 = vmatmul.mubr.msk.bf16.vlgmr.msra.gmra.mxu1 %vm193_vm0, %v115_v21  ;;  %v105_v52 = vadd.f32 %v2111_v12, %v82_v47  ;;  %v1902_v54 = vld [vmem:[#allocation2 + $0x24] ss:$8 sps:$4 sm:$0xff]   ;;  %v1900_v56 = vld [vmem:[#allocation2 + $0x20] ss:$8 sps:$4 sm:$0xff]   ;;  %v84_v58 = vmul.f32 %v2106_v11, %v61_v50  ;;  %v85_v59 = vmul.f32 %v2106_v11, %v62_v55  ;;  %v1908_v60 = vld [vmem:[#allocation2 + $0x14] ss:$8 sps:$4 sm:$0xff]  }
  0x19   :  { %260 = vmatprep.mubr.bf16.mxu0 %v2007_v0  ;;  %373 = vmatprep.mubr.bf16.mxu1 %v2007_v0  ;;  %v117_v46 = vpack.c.bf16 %v104_v41, %v103_v40  ;;  %v106_v53 = vadd.f32 %v2111_v12, %v83_v48  ;;  %v1906_v61 = vld [vmem:[#allocation2 + $0x10] ss:$8 sps:$4 sm:$0xff]   ;;  %v1914_v1 = vld [vmem:[#allocation2 + $0x4] ss:$8 sps:$4 sm:$0xff]   ;;  %v1912_v4 = vld [vmem:[#allocation2] ss:$8 sps:$4 sm:$0xff]  }
  0x1a   :  { %1100 = vmatpush1.bf16.msra.mxu1 %v1870_v25  ;;  %681 = vmatpush1.bf16.msra.mxu0 %v661_v37  ;;  %v107_v62 = vadd.f32 %v2111_v12, %v84_v58  ;;  %v108_v63 = vadd.f32 %v2111_v12, %v85_v59  ;;  %v63_v2 = vld [vmem:[%s2622_s2 + $0x50] sm:$0xff]  ;;  %v64_v3 = vld [vmem:[%s2622_s2 + $0x58] sm:$0xff]  ;;  %v1926_v14 = vld [vmem:[#allocation2 + $0xe4] ss:$8 sps:$4 sm:$0xff]  }
  0x1b   :  { %1101 = vmatprep.subr.bf16.mxu1 %v1878_v33  ;;  %1212 = vmatprep.subr.bf16.mxu0 %v1875_v31  ;;  %v118_v57 = vpack.c.bf16 %v106_v53, %v105_v52  ;;  %v86_v6 = vmul.f32 %v2106_v11, %v63_v2  ;;  %v87_v7 = vmul.f32 %v2106_v11, %v64_v3  ;;  %v1920_v8 = vld [vmem:[#allocation2 + $0xf4] ss:$8 sps:$4 sm:$0xff]   ;;  %v1918_v9 = vld [vmem:[#allocation2 + $0xf0] ss:$8 sps:$4 sm:$0xff]   ;;  %v65_v15 = vld [vmem:[%s2622_s2 + $0x60] sm:$0xff] }
  0x1c   :  { %v119_v5 = vpack.c.bf16 %v108_v63, %v107_v62  ;;  %v66_v16 = vld [vmem:[%s2622_s2 + $0x68] sm:$0xff]  ;;  %v88_v19 = vmul.f32 %v2106_v11, %v65_v15  ;;  %v1930_v21 = vld [vmem:[#allocation2 + $0xd0] ss:$8 sps:$4 sm:$0xff]   ;;  %v1932_v22 = vld [vmem:[#allocation2 + $0xd4] ss:$8 sps:$4 sm:$0xff]  }
  0x1d   :  { %v109_v10 = vadd.f32 %v2111_v12, %v86_v6  ;;  %v110_v13 = vadd.f32 %v2111_v12, %v87_v7  ;;  %v1924_v17 = vld [vmem:[#allocation2 + $0xe0] ss:$8 sps:$4 sm:$0xff]   ;;  %v89_v20 = vmul.f32 %v2106_v11, %v66_v16  ;;  %v1938_v23 = vld [vmem:[#allocation2 + $0xc4] ss:$8 sps:$4 sm:$0xff]   ;;  %v67_v24 = vld [vmem:[%s2622_s2 + $0x70] sm:$0xff] }
  0x1e   :  { %1102 = vmatpush1.bf16.msra.mxu1 %v1876_v32  ;;  %v68_v25 = vld [vmem:[%s2622_s2 + $0x78] sm:$0xff]  ;;  %v111_v26 = vadd.f32 %v2111_v12, %v88_v19  ;;  %v1936_v28 = vld [vmem:[#allocation2 + $0xc0] ss:$8 sps:$4 sm:$0xff]   ;;  %v90_v30 = vmul.f32 %v2106_v11, %v67_v24  ;;  %v606_v40 = vld [vmem:[%s2623_s3 + $0x10] sm:$0xff] }
  0x1f   :  { %1103 = vmatprep.subr.bf16.mxu1 %v1884_v38  ;;  %v120_v18 = vpack.c.bf16 %v110_v13, %v109_v10  ;;  %v112_v27 = vadd.f32 %v2111_v12, %v89_v20  ;;  %v91_v31 = vmul.f32 %v2106_v11, %v68_v25  ;;  %v1944_v32 = vld [vmem:[#allocation2 + $0xb4] ss:$8 sps:$4 sm:$0xff]   ;;  %v1942_v33 = vld [vmem:[#allocation2 + $0xb0] ss:$8 sps:$4 sm:$0xff]   ;;  %v604_v11 = vld [vmem:[%s2623_s3] sm:$0xff] }
  0x20   :  { %1681 = vmatmul.mubr.msk.bf16.gmra.mxu0 %vm193_vm0, %v116_v34  ;;  %1689 = vmatmul.mubr.msk.bf16.gmra.mxu1 %vm193_vm0, %v116_v34  ;;  %v113_v34 = vadd.f32 %v2111_v12, %v90_v30  ;;  %v1873_v38 = vld [vmem:[#allocation2 + $0x170] ss:$8 sps:$4 sm:$0xff]   ;;  %v1950_v41 = vld [vmem:[#allocation2 + $0xa4] ss:$8 sps:$4 sm:$0xff]   ;;  %v1879_v43 = vld [vmem:[#allocation2 + $0x160] ss:$8 sps:$4 sm:$0xff]  }
  0x21   :  { %270 = vmatprep.mubr.bf16.mxu0 %v2007_v0  ;;  %383 = vmatprep.mubr.bf16.mxu1 %v2007_v0  ;;  %v121_v29 = vpack.c.bf16 %v112_v27, %v111_v26  ;;  %v114_v35 = vadd.f32 %v2111_v12, %v91_v31  ;;  %v605_v12 = vld [vmem:[%s2623_s3 + $0x8] sm:$0xff]  ;;  %v607_v42 = vld [vmem:[%s2623_s3 + $0x18] sm:$0xff]  ;;  %v614_v13 = vld [vmem:[%s2623_s3 + $0x50] sm:$0xff] }
  0x22   :  { %1104 = vmatpush1.bf16.msra.mxu1 %v1882_v39  ;;  %v620_v37 = vpack.c.bf16 %v605_v12, %v604_v11  ;;  %v1881_v39 = vld [vmem:[#allocation2 + $0x164] ss:$8 sps:$4 sm:$0xff]   ;;  %v1956_v47 = vld [vmem:[#allocation2 + $0x94] ss:$8 sps:$4 sm:$0xff]   ;;  %v1885_v48 = vld [vmem:[#allocation2 + $0x150] ss:$8 sps:$4 sm:$0xff]  }
  0x23   :  { %1105 = vmatprep.subr.bf16.mxu1 %v1890_v44  ;;  %v122_v36 = vpack.c.bf16 %v114_v35, %v113_v34  ;;  %v1948_v44 = vld [vmem:[#allocation2 + $0xa0] ss:$8 sps:$4 sm:$0xff]   ;;  %v1893_v50 = vld [vmem:[#allocation2 + $0x144] ss:$8 sps:$4 sm:$0xff]   ;;  %v1899_v55 = vld [vmem:[#allocation2 + $0x134] ss:$8 sps:$4 sm:$0xff]   ;;  %v133_v35 = vlaneseq }
  0x24   :  { %v609_v52 = vld [vmem:[%s2623_s3 + $0x28] sm:$0xff]  ;;  %v1897_v58 = vld [vmem:[#allocation2 + $0x130] ss:$8 sps:$4 sm:$0xff]   ;;  %v1911_v63 = vld [vmem:[#allocation2 + $0x114] ss:$8 sps:$4 sm:$0xff]  }
  0x25   :  { %v1891_v53 = vld [vmem:[#allocation2 + $0x140] ss:$8 sps:$4 sm:$0xff]   ;;  %v1905_v59 = vld [vmem:[#allocation2 + $0x124] ss:$8 sps:$4 sm:$0xff]   ;;  %v1909_v2 = vld [vmem:[#allocation2 + $0x110] ss:$8 sps:$4 sm:$0xff]  }
  0x26   :  { %1106 = vmatpush1.bf16.msra.mxu1 %v1888_v45  ;;  %v1887_v45 = vld [vmem:[#allocation2 + $0x154] ss:$8 sps:$4 sm:$0xff]   ;;  %v1903_v62 = vld [vmem:[#allocation2 + $0x120] ss:$8 sps:$4 sm:$0xff]   ;;  %v1917_v3 = vld [vmem:[#allocation2 + $0x104] ss:$8 sps:$4 sm:$0xff]  }
  0x27   :  { %1107 = vmatprep.subr.bf16.mxu1 %v1896_v49  ;;  %v1954_v49 = vld [vmem:[#allocation2 + $0x90] ss:$8 sps:$4 sm:$0xff]   ;;  %v1915_v6 = vld [vmem:[#allocation2 + $0x100] ss:$8 sps:$4 sm:$0xff]   ;;  %v1923_v7 = vld [vmem:[#allocation2 + $0x1f4] ss:$8 sps:$4 sm:$0xff]  }
  0x28   :  { %1682 = vmatmul.mubr.msk.bf16.gmra.mxu0 %vm193_vm0, %v117_v46  ;;  %1690 = vmatmul.mubr.msk.bf16.gmra.mxu1 %vm193_vm0, %v117_v46  ;;  %v621_v46 = vpack.c.bf16 %v607_v42, %v606_v40  ;;  %v1929_v10 = vld [vmem:[#allocation2 + $0x1e4] ss:$8 sps:$4 sm:$0xff]   ;;  %v1927_v15 = vld [vmem:[#allocation2 + $0x1e0] ss:$8 sps:$4 sm:$0xff]   ;;  %v1935_v16 = vld [vmem:[#allocation2 + $0x1d4] ss:$8 sps:$4 sm:$0xff]  }
  0x29   :  { %280 = vmatprep.mubr.bf16.mxu0 %v2007_v0  ;;  %393 = vmatprep.mubr.bf16.mxu1 %v2007_v0  ;;  %v1941_v19 = vld [vmem:[#allocation2 + $0x1c4] ss:$8 sps:$4 sm:$0xff]   ;;  %v1945_v25 = vld [vmem:[#allocation2 + $0x1b0] ss:$8 sps:$4 sm:$0xff]   ;;  %v1959_v30 = vld [vmem:[#allocation2 + $0x194] ss:$8 sps:$4 sm:$0xff]  }
  0x2a   :  { %1108 = vmatpush1.bf16.msra.mxu1 %v1894_v51  ;;  %v608_v51 = vld [vmem:[%s2623_s3 + $0x20] sm:$0xff]  ;;  %v618_v27 = vld [vmem:[%s2623_s3 + $0x70] sm:$0xff]  ;;  %v1966_v34 = vld [vmem:[%s2629_s9 + $0x78] sm:$0xff]  }
  0x2b   :  { %1109 = vmatprep.subr.bf16.mxu1 %v1902_v54  ;;  %v1962_v54 = vld [vmem:[#allocation2 + $0x84] ss:$8 sps:$4 sm:$0xff]  }
  0x2c   :  { %v616_v20 = vld [vmem:[%s2623_s3 + $0x60] sm:$0xff] }
  0x2d   :  { %v1953_v26 = vld [vmem:[#allocation2 + $0x1a4] ss:$8 sps:$4 sm:$0xff]  }
  0x2e   :  { %1110 = vmatpush1.bf16.msra.mxu1 %v1900_v56  ;;  %v1960_v56 = vld [vmem:[#allocation2 + $0x80] ss:$8 sps:$4 sm:$0xff]  }
  0x2f   :  { %1111 = vmatprep.subr.bf16.mxu1 %v1908_v60  ;;  %v610_v60 = vld [vmem:[%s2623_s3 + $0x30] sm:$0xff] }
  0x30   :  { %1683 = vmatmul.mubr.msk.bf16.gmra.mxu0 %vm193_vm0, %v118_v57  ;;  %1691 = vmatmul.mubr.msk.bf16.gmra.mxu1 %vm193_vm0, %v118_v57  ;;  %v622_v57 = vpack.c.bf16 %v609_v52, %v608_v51 }
  0x31   :  { %290 = vmatprep.mubr.bf16.mxu0 %v2007_v0  ;;  %403 = vmatprep.mubr.bf16.mxu1 %v2007_v0 }
  0x32   :  { %1112 = vmatpush1.bf16.msra.mxu1 %v1906_v61  ;;  %v611_v61 = vld [vmem:[%s2623_s3 + $0x38] sm:$0xff] }
  0x33   :  { %1113 = vmatprep.subr.bf16.mxu1 %v1914_v1  ;;  %v623_v1 = vpack.c.bf16 %v611_v61, %v610_v60 }
  0x36   :  { %1114 = vmatpush1.bf16.msra.mxu1 %v1912_v4  ;;  %v612_v4 = vld [vmem:[%s2623_s3 + $0x40] sm:$0xff] }
  0x37   :  { %1115 = vmatprep.subr.bf16.mxu1 %v1920_v8 }
  0x38   :  { %1684 = vmatmul.mubr.msk.bf16.gmra.mxu0 %vm193_vm0, %v119_v5  ;;  %1692 = vmatmul.mubr.msk.bf16.gmra.mxu1 %vm193_vm0, %v119_v5  ;;  %v613_v5 = vld [vmem:[%s2623_s3 + $0x48] sm:$0xff] }
  0x39   :  { %300 = vmatprep.mubr.bf16.mxu0 %v2007_v0  ;;  %413 = vmatprep.mubr.bf16.mxu1 %v2007_v0  ;;  %v624_v8 = vpack.c.bf16 %v613_v5, %v612_v4 }
  0x3a   :  { %1116 = vmatpush2.bf16.msra.mxu1 %v1918_v9  ;;  %v1921_v9 = vld [vmem:[#allocation2 + $0x1f0] ss:$8 sps:$4 sm:$0xff]  }
  0x3b   :  { %1117 = vmatprep.subr.bf16.mxu1 %v1926_v14  ;;  %v615_v14 = vld [vmem:[%s2623_s3 + $0x58] sm:$0xff] }
  0x3e   :  { %1118 = vmatpush2.bf16.msra.mxu1 %v1924_v17  ;;  %v625_v17 = vpack.c.bf16 %v615_v14, %v614_v13  ;;  %v1967_v13 = vld [vmem:[%s2629_s9 + $0x38] sm:$0xff]  }
  0x3f   :  { %1119 = vmatprep.subr.bf16.mxu1 %v1932_v22  ;;  %v1939_v22 = vld [vmem:[#allocation2 + $0x1c0] ss:$8 sps:$4 sm:$0xff]  }
  0x40   :  { %1685 = vmatmul.mubr.msk.bf16.gmra.mxu0 %vm193_vm0, %v120_v18  ;;  %1693 = vmatmul.mubr.msk.bf16.gmra.mxu1 %vm193_vm0, %v120_v18  ;;  %v1933_v18 = vld [vmem:[#allocation2 + $0x1d0] ss:$8 sps:$4 sm:$0xff]  }
  0x41   :  { %310 = vmatprep.mubr.bf16.mxu0 %v2007_v0  ;;  %423 = vmatprep.mubr.bf16.mxu1 %v2007_v0 }
  0x42   :  { %1120 = vmatpush2.bf16.msra.mxu1 %v1930_v21  ;;  %v617_v21 = vld [vmem:[%s2623_s3 + $0x68] sm:$0xff] }
  0x43   :  { %1121 = vmatprep.subr.bf16.mxu1 %v1938_v23  ;;  %v1947_v23 = vld [vmem:[#allocation2 + $0x1b4] ss:$8 sps:$4 sm:$0xff]   ;;  %v626_v24 = vpack.c.bf16 %v617_v21, %v616_v20 }
  0x46   :  { %1122 = vmatpush2.bf16.msra.mxu1 %v1936_v28  ;;  %v619_v28 = vld [vmem:[%s2623_s3 + $0x78] sm:$0xff] }
  0x47   :  { %1123 = vmatprep.subr.bf16.mxu1 %v1944_v32  ;;  %v627_v31 = vpack.c.bf16 %v619_v28, %v618_v27  ;;  %v1957_v32 = vld [vmem:[#allocation2 + $0x190] ss:$8 sps:$4 sm:$0xff]  }
  0x48   :  { %1686 = vmatmul.mubr.msk.bf16.gmra.mxu0 %vm193_vm0, %v121_v29  ;;  %1694 = vmatmul.mubr.msk.bf16.gmra.mxu1 %vm193_vm0, %v121_v29  ;;  %v1951_v29 = vld [vmem:[#allocation2 + $0x1a0] ss:$8 sps:$4 sm:$0xff]  }
  0x49   :  { %320 = vmatprep.mubr.bf16.mxu0 %v2007_v0  ;;  %433 = vmatprep.mubr.bf16.mxu1 %v2007_v0 }
  0x4a   :  { %1124 = vmatpush2.bf16.msra.mxu1 %v1942_v33  ;;  %v1965_v33 = vld [vmem:[#allocation2 + $0x184] ss:$8 sps:$4 sm:$0xff]  }
  0x4b   :  { %1125 = vmatprep.subr.bf16.mxu1 %v1950_v41 }
  0x4e   :  { %1126 = vmatpush2.bf16.msra.mxu1 %v1948_v44 }
  0x4f   :  { %1127 = vmatprep.subr.bf16.mxu1 %v1956_v47 }
  0x50   :  { %1687 = vmatmul.mubr.msk.bf16.gmra.mxu0 %vm193_vm0, %v122_v36  ;;  %1695 = vmatmul.mubr.msk.bf16.gmra.mxu1 %vm193_vm0, %v122_v36  ;;  %v2287_v36 = vshrl.u32 %v133_v35, 7 }
  0x51   :  { %698 = vmatprep.mubr.bf16.mxu0 %v2007_v0 }
  0x52   :  { %1128 = vmatpush2.bf16.msra.mxu1 %v1954_v49  ;;  %v139_v11 = vsub.s32 1, %v2287_v36  ;;  %v147_v12 = vsub.s32 3, %v2287_v36 }
  0x53   :  { %1129 = vmatprep.subr.bf16.mxu1 %v1962_v54 }
  0x56   :  { %1130 = vmatpush2.bf16.msra.mxu1 %v1960_v56 }
  0x57   :  { %1788 = vmatprep.subr.bf16.mxu1 %v1966_v34 }
  0x58   :  { %1699 = vmatmul.mubr.msk.bf16.vlgmr.msra.gmra.mxu0 %vm634_vm2, %v620_v37  ;;  %v135_v37 = vsub.s32 0, %v2287_v36 }
  0x59   :  { %1213 = vmatpush1.bf16.msra.mxu0 %v1873_v38  ;;  %708 = vmatprep.mubr.bf16.mxu0 %v2007_v0  ;;  %v143_v38 = vsub.s32 2, %v2287_v36 }
  0x5a   :  { %1214 = vmatprep.subr.bf16.mxu0 %v1881_v39  ;;  %v131_v39 = vld [vmem:[%s2625_s5] sm:$0xf] }
  0x5b   :  { %v2298_v42 = vrot.slane %v131_v39, %v139_v11  ;;  %v2304_v44 = vrot.slane %v131_v39, %v135_v37 }
  0x5d   :  { %1215 = vmatpush1.bf16.msra.mxu0 %v1879_v43  ;;  %v2300_v43 = vrot.slane %v131_v39, %v147_v12 }
  0x5e   :  { %1216 = vmatprep.subr.bf16.mxu0 %v1887_v45  ;;  %v2306_v45 = vrot.slane %v131_v39, %v143_v38 }
  0x60   :  { %1700 = vmatmul.mubr.msk.bf16.gmra.mxu0 %vm634_vm2, %v621_v46 }
  0x61   :  { %1217 = vmatpush1.bf16.msra.mxu0 %v1885_v48  ;;  %718 = vmatprep.mubr.bf16.mxu0 %v2007_v0 }
  0x62   :  { %1218 = vmatprep.subr.bf16.mxu0 %v1893_v50 }
  0x65   :  { %1219 = vmatpush1.bf16.msra.mxu0 %v1891_v53 }
  0x66   :  { %1220 = vmatprep.subr.bf16.mxu0 %v1899_v55 }
  0x68   :  { %1701 = vmatmul.mubr.msk.bf16.gmra.mxu0 %vm634_vm2, %v622_v57 }
  0x69   :  { %1221 = vmatpush1.bf16.msra.mxu0 %v1897_v58  ;;  %728 = vmatprep.mubr.bf16.mxu0 %v2007_v0 }
  0x6a   :  { %1222 = vmatprep.subr.bf16.mxu0 %v1905_v59 }
  0x6d   :  { %1223 = vmatpush1.bf16.msra.mxu0 %v1903_v62 }
  0x6e   :  { %1224 = vmatprep.subr.bf16.mxu0 %v1911_v63 }
  0x70   :  { %1702 = vmatmul.mubr.msk.bf16.gmra.mxu0 %vm634_vm2, %v623_v1 }
  0x71   :  { %1225 = vmatpush1.bf16.msra.mxu0 %v1909_v2  ;;  %738 = vmatprep.mubr.bf16.mxu0 %v2007_v0 }
  0x72   :  { %1226 = vmatprep.subr.bf16.mxu0 %v1917_v3 }
  0x75   :  { %1227 = vmatpush1.bf16.msra.mxu0 %v1915_v6 }
  0x76   :  { %1228 = vmatprep.subr.bf16.mxu0 %v1923_v7 }
  0x78   :  { %1703 = vmatmul.mubr.msk.bf16.gmra.mxu0 %vm634_vm2, %v624_v8 }
  0x79   :  { %1229 = vmatpush2.bf16.msra.mxu0 %v1921_v9  ;;  %748 = vmatprep.mubr.bf16.mxu0 %v2007_v0 }
  0x7a   :  { %1230 = vmatprep.subr.bf16.mxu0 %v1929_v10 }
  0x7d   :  { %1231 = vmatpush2.bf16.msra.mxu0 %v1927_v15 }
  0x7e   :  { %1232 = vmatprep.subr.bf16.mxu0 %v1935_v16 }
  0x80   :  { %1704 = vmatmul.mubr.msk.bf16.gmra.mxu0 %vm634_vm2, %v625_v17 }
  0x81   :  { %1233 = vmatpush2.bf16.msra.mxu0 %v1933_v18  ;;  %758 = vmatprep.mubr.bf16.mxu0 %v2007_v0 }
  0x82   :  { %1234 = vmatprep.subr.bf16.mxu0 %v1941_v19  ;;  %v1968_v19 = vld [vmem:[%s2629_s9 + $0x70] sm:$0xff]  }
  0x85   :  { %1235 = vmatpush2.bf16.msra.mxu0 %v1939_v22 }
  0x86   :  { %1236 = vmatprep.subr.bf16.mxu0 %v1947_v23 }
  0x88   :  { %1705 = vmatmul.mubr.msk.bf16.gmra.mxu0 %vm634_vm2, %v626_v24 }
  0x89   :  { %1237 = vmatpush2.bf16.msra.mxu0 %v1945_v25  ;;  %768 = vmatprep.mubr.bf16.mxu0 %v2007_v0  ;;  %v1963_v0 = vld [vmem:[#allocation2 + $0x180] ss:$8 sps:$4 sm:$0xff]  }
  0x8a   :  { %1238 = vmatprep.subr.bf16.mxu0 %v1953_v26 }
  0x8d   :  { %1239 = vmatpush2.bf16.msra.mxu0 %v1951_v29  ;;  %v1969_v29 = vld [vmem:[%s2629_s9 + $0x30] sm:$0xff]  }
  0x8e   :  { %1240 = vmatprep.subr.bf16.mxu0 %v1959_v30 }
  0x90   :  { %1706 = vmatmul.mubr.msk.bf16.gmra.mxu0 %vm634_vm2, %v627_v31 }
  0x91   :  { %1241 = vmatpush2.bf16.msra.mxu0 %v1957_v32 }
  0x92   :  { %1242 = vmatprep.subr.bf16.mxu0 %v1965_v33 }
  0x95   :  { %1243 = vmatpush2.bf16.msra.mxu0 %v1963_v0  ;;  %v1970_v0 = vld [vmem:[%s2629_s9 + $0x68] sm:$0xff]  }
  0xd8   :  { %v252_v40 = vpop.f32.mrf.mxu0  ;;  %v365_v41 = vpop.f32.mrf.mxu1 }
  0xd9   :  { %v253_v54 = vadd.f32 %v252_v40, %v2304_v44  ;;  %v366_v55 = vadd.f32 %v365_v41, %v2306_v45 }
  0xda   :  { %v254_v46 = vpop.f32.mrf.mxu0  ;;  %v367_v47 = vpop.f32.mrf.mxu1 }
  0xdb   :  { %v255_v50 = vadd.f32 %v254_v46, %v2298_v42  ;;  %v368_v51 = vadd.f32 %v367_v47, %v2300_v43  ;;  %v444_v5 = vmax.f32 %v253_v54, 0.0  ;;  %v446_v6 = vmax.f32 %v366_v55, 0.0  ;;  %v1972_v55 = vld [vmem:[%s2629_s9 + $0x60] sm:$0xff]  }
  0xdc   :  { %v256_v48 = vpop.f32.mrf.mxu0  ;;  %v369_v49 = vpop.f32.mrf.mxu1 }
  0xdd   :  { %v257_v52 = vadd.f32 %v256_v48, %v2304_v44  ;;  %v370_v53 = vadd.f32 %v369_v49, %v2306_v45  ;;  %v445_v1 = vmax.f32 %v255_v50, 0.0  ;;  %v447_v2 = vmax.f32 %v368_v51, 0.0  ;;  %v1971_v49 = vld [vmem:[%s2629_s9 + $0x28] sm:$0xff]  }
  0xde   :  { %v258_v56 = vpop.f32.mrf.mxu0  ;;  %v371_v57 = vpop.f32.mrf.mxu1 }
  0xdf   :  { %v259_v58 = vadd.f32 %v258_v56, %v2298_v42  ;;  %v372_v59 = vadd.f32 %v371_v57, %v2300_v43  ;;  %v448_v60 = vmax.f32 %v257_v52, 0.0  ;;  %v450_v61 = vmax.f32 %v370_v53, 0.0 }
  0xe0   :  { %v262_v62 = vpop.f32.mrf.mxu0  ;;  %v375_v63 = vpop.f32.mrf.mxu1 }
  0xe1   :  { %v449_v3 = vmax.f32 %v259_v58, 0.0  ;;  %v451_v4 = vmax.f32 %v372_v59, 0.0  ;;  %v508_v14 = vpack.c.bf16 %v448_v60, %v444_v5  ;;  %v510_v15 = vpack.c.bf16 %v450_v61, %v446_v6 }
  0xe2   :  { %v264_v7 = vpop.f32.mrf.mxu0  ;;  %v377_v8 = vpop.f32.mrf.mxu1  ;;  %v263_v23 = vadd.f32 %v262_v62, %v2304_v44  ;;  %v376_v24 = vadd.f32 %v375_v63, %v2306_v45 }
  0xe3   :  { %v509_v9 = vpack.c.bf16 %v449_v3, %v445_v1  ;;  %v511_v10 = vpack.c.bf16 %v451_v4, %v447_v2  ;;  %v265_v16 = vadd.f32 %v264_v7, %v2298_v42  ;;  %v378_v20 = vadd.f32 %v377_v8, %v2300_v43  ;;  %v1973_v2 = vld [vmem:[%s2629_s9 + $0x20] sm:$0xff]   ;;  %v1974_v7 = vld [vmem:[%s2629_s9 + $0x58] sm:$0xff]  }
  0xe4   :  { %v266_v17 = vpop.f32.mrf.mxu0  ;;  %v379_v18 = vpop.f32.mrf.mxu1  ;;  %v452_v39 = vmax.f32 %v263_v23, 0.0  ;;  %v454_v40 = vmax.f32 %v376_v24, 0.0 }
  0xe5   :  { %v267_v21 = vadd.f32 %v266_v17, %v2304_v44  ;;  %v380_v22 = vadd.f32 %v379_v18, %v2306_v45  ;;  %1131 = vmatprep.mubr.bf16.mxu1 %v509_v9  ;;  %1244 = vmatprep.mubr.bf16.mxu0 %v511_v10  ;;  %v453_v34 = vmax.f32 %v265_v16, 0.0  ;;  %v455_v35 = vmax.f32 %v378_v20, 0.0  ;;  %v1975_v20 = vld [vmem:[%s2629_s9 + $0x18] sm:$0xff]  }
  0xe6   :  { %v268_v25 = vpop.f32.mrf.mxu0  ;;  %v381_v26 = vpop.f32.mrf.mxu1  ;;  %1132 = vmatmul.mubr.bf16.vlgmr.msra.gmra.mxu1 %v508_v14  ;;  %1245 = vmatmul.mubr.bf16.vlgmr.msra.gmra.mxu0 %v510_v15 }
  0xe7   :  { %v269_v27 = vadd.f32 %v268_v25, %v2298_v42  ;;  %v382_v28 = vadd.f32 %v381_v26, %v2300_v43  ;;  %1789 = vmatpush3.bf16.msra.mxu1 %v1967_v13  ;;  %v456_v30 = vmax.f32 %v267_v21, 0.0  ;;  %v458_v31 = vmax.f32 %v380_v22, 0.0  ;;  %v1976_v26 = vld [vmem:[%s2629_s9 + $0x50] sm:$0xff]  }
  0xe8   :  { %v272_v32 = vpop.f32.mrf.mxu0  ;;  %v385_v33 = vpop.f32.mrf.mxu1  ;;  %1790 = vmatprep.subr.bf16.mxu1 %v1968_v19 }
  0xe9   :  { %v457_v12 = vmax.f32 %v269_v27, 0.0  ;;  %v459_v38 = vmax.f32 %v382_v28, 0.0  ;;  %v512_v50 = vpack.c.bf16 %v456_v30, %v452_v39  ;;  %v514_v51 = vpack.c.bf16 %v458_v31, %v454_v40 }
  0xea   :  { %v274_v41 = vpop.f32.mrf.mxu0  ;;  %v387_v46 = vpop.f32.mrf.mxu1  ;;  %v273_v59 = vadd.f32 %v272_v32, %v2304_v44  ;;  %v386_v60 = vadd.f32 %v385_v33, %v2306_v45 }
  0xeb   :  { %v513_v47 = vpack.c.bf16 %v457_v12, %v453_v34  ;;  %v515_v48 = vpack.c.bf16 %v459_v38, %v455_v35  ;;  %1791 = vmatpush3.bf16.msra.mxu1 %v1969_v29  ;;  %v275_v52 = vadd.f32 %v274_v41, %v2298_v42  ;;  %v388_v56 = vadd.f32 %v387_v46, %v2300_v43  ;;  %v1977_v35 = vld [vmem:[%s2629_s9 + $0x10] sm:$0xff]  }
  0xec   :  { %v276_v53 = vpop.f32.mrf.mxu0  ;;  %v389_v54 = vpop.f32.mrf.mxu1  ;;  %1792 = vmatprep.subr.bf16.mxu1 %v1970_v0  ;;  %v460_v14 = vmax.f32 %v273_v59, 0.0  ;;  %v462_v15 = vmax.f32 %v386_v60, 0.0 }
  0xed   :  { %v277_v57 = vadd.f32 %v276_v53, %v2304_v44  ;;  %v390_v58 = vadd.f32 %v389_v54, %v2306_v45  ;;  %1141 = vmatprep.mubr.bf16.mxu1 %v513_v47  ;;  %1254 = vmatprep.mubr.bf16.mxu0 %v515_v48  ;;  %v461_v8 = vmax.f32 %v275_v52, 0.0  ;;  %v463_v9 = vmax.f32 %v388_v56, 0.0 }
  0xee   :  { %v278_v61 = vpop.f32.mrf.mxu0  ;;  %v391_v62 = vpop.f32.mrf.mxu1  ;;  %1142 = vmatmul.mubr.bf16.gmra.mxu1 %v512_v50  ;;  %1255 = vmatmul.mubr.bf16.gmra.mxu0 %v514_v51 }
  0xef   :  { %v279_v63 = vadd.f32 %v278_v61, %v2298_v42  ;;  %v392_v1 = vadd.f32 %v391_v62, %v2300_v43  ;;  %1793 = vmatpush3.bf16.msra.mxu1 %v1971_v49  ;;  %v464_v3 = vmax.f32 %v277_v57, 0.0  ;;  %v466_v4 = vmax.f32 %v390_v58, 0.0 }
  0xf0   :  { %v282_v5 = vpop.f32.mrf.mxu0  ;;  %v395_v6 = vpop.f32.mrf.mxu1  ;;  %1794 = vmatprep.subr.bf16.mxu1 %v1972_v55 }
  0xf1   :  { %v465_v10 = vmax.f32 %v279_v63, 0.0  ;;  %v467_v13 = vmax.f32 %v392_v1, 0.0  ;;  %v516_v21 = vpack.c.bf16 %v464_v3, %v460_v14  ;;  %v518_v22 = vpack.c.bf16 %v466_v4, %v462_v15 }
  0xf2   :  { %v284_v16 = vpop.f32.mrf.mxu0  ;;  %v397_v17 = vpop.f32.mrf.mxu1  ;;  %v283_v30 = vadd.f32 %v282_v5, %v2304_v44  ;;  %v396_v31 = vadd.f32 %v395_v6, %v2306_v45 }
  0xf3   :  { %v517_v18 = vpack.c.bf16 %v465_v10, %v461_v8  ;;  %v519_v19 = vpack.c.bf16 %v467_v13, %v463_v9  ;;  %1795 = vmatpush3.bf16.msra.mxu1 %v1973_v2  ;;  %v285_v23 = vadd.f32 %v284_v16, %v2298_v42  ;;  %v398_v27 = vadd.f32 %v397_v17, %v2300_v43 }
  0xf4   :  { %v286_v24 = vpop.f32.mrf.mxu0  ;;  %v399_v25 = vpop.f32.mrf.mxu1  ;;  %1796 = vmatprep.subr.bf16.mxu1 %v1974_v7  ;;  %v468_v49 = vmax.f32 %v283_v30, 0.0  ;;  %v470_v50 = vmax.f32 %v396_v31, 0.0 }
  0xf5   :  { %v287_v28 = vadd.f32 %v286_v24, %v2304_v44  ;;  %v400_v29 = vadd.f32 %v399_v25, %v2306_v45  ;;  %1151 = vmatprep.mubr.bf16.mxu1 %v517_v18  ;;  %1264 = vmatprep.mubr.bf16.mxu0 %v519_v19  ;;  %v469_v41 = vmax.f32 %v285_v23, 0.0  ;;  %v471_v46 = vmax.f32 %v398_v27, 0.0 }
  0xf6   :  { %v288_v32 = vpop.f32.mrf.mxu0  ;;  %v401_v33 = vpop.f32.mrf.mxu1  ;;  %1152 = vmatmul.mubr.bf16.gmra.mxu1 %v516_v21  ;;  %1265 = vmatmul.mubr.bf16.gmra.mxu0 %v518_v22 }
  0xf7   :  { %v289_v0 = vadd.f32 %v288_v32, %v2298_v42  ;;  %v402_v34 = vadd.f32 %v401_v33, %v2300_v43  ;;  %1797 = vmatpush3.bf16.msra.mxu1 %v1975_v20  ;;  %v472_v12 = vmax.f32 %v287_v28, 0.0  ;;  %v474_v38 = vmax.f32 %v400_v29, 0.0 }
  0xf8   :  { %v292_v39 = vpop.f32.mrf.mxu0  ;;  %v405_v40 = vpop.f32.mrf.mxu1  ;;  %1798 = vmatprep.subr.bf16.mxu1 %v1976_v26 }
  0xf9   :  { %v473_v47 = vmax.f32 %v289_v0, 0.0  ;;  %v475_v48 = vmax.f32 %v402_v34, 0.0  ;;  %v520_v55 = vpack.c.bf16 %v472_v12, %v468_v49  ;;  %v522_v56 = vpack.c.bf16 %v474_v38, %v470_v50 }
  0xfa   :  { %v294_v51 = vpop.f32.mrf.mxu0  ;;  %v407_v52 = vpop.f32.mrf.mxu1  ;;  %v293_v63 = vadd.f32 %v292_v39, %v2304_v44  ;;  %v406_v1 = vadd.f32 %v405_v40, %v2306_v45 }
  0xfb   :  { %v521_v53 = vpack.c.bf16 %v473_v47, %v469_v41  ;;  %v523_v54 = vpack.c.bf16 %v475_v48, %v471_v46  ;;  %1799 = vmatpush3.bf16.msra.mxu1 %v1977_v35  ;;  %v295_v57 = vadd.f32 %v294_v51, %v2298_v42  ;;  %v408_v60 = vadd.f32 %v407_v52, %v2300_v43 }
  0xfc   :  { %v296_v58 = vpop.f32.mrf.mxu0  ;;  %v409_v59 = vpop.f32.mrf.mxu1  ;;  %v476_v16 = vmax.f32 %v293_v63, 0.0  ;;  %v478_v17 = vmax.f32 %v406_v1, 0.0 }
  0xfd   :  { %v297_v61 = vadd.f32 %v296_v58, %v2304_v44  ;;  %v410_v62 = vadd.f32 %v409_v59, %v2306_v45  ;;  %1161 = vmatprep.mubr.bf16.mxu1 %v521_v53  ;;  %1274 = vmatprep.mubr.bf16.mxu0 %v523_v54  ;;  %v477_v10 = vmax.f32 %v295_v57, 0.0  ;;  %v479_v13 = vmax.f32 %v408_v60, 0.0 }
  0xfe   :  { %v298_v2 = vpop.f32.mrf.mxu0  ;;  %v411_v3 = vpop.f32.mrf.mxu1  ;;  %1162 = vmatmul.mubr.bf16.gmra.mxu1 %v520_v55  ;;  %1275 = vmatmul.mubr.bf16.gmra.mxu0 %v522_v56 }
  0xff   :  { %v299_v4 = vadd.f32 %v298_v2, %v2298_v42  ;;  %v412_v5 = vadd.f32 %v411_v3, %v2300_v43  ;;  %v480_v6 = vmax.f32 %v297_v61, 0.0  ;;  %v482_v7 = vmax.f32 %v410_v62, 0.0 }
 0x100   :  { %v302_v8 = vpop.f32.mrf.mxu0  ;;  %v415_v9 = vpop.f32.mrf.mxu1 }
 0x101   :  { %v481_v14 = vmax.f32 %v299_v4, 0.0  ;;  %v483_v15 = vmax.f32 %v412_v5, 0.0  ;;  %v524_v22 = vpack.c.bf16 %v480_v6, %v476_v16  ;;  %v526_v23 = vpack.c.bf16 %v482_v7, %v478_v17 }
 0x102   :  { %v304_v18 = vpop.f32.mrf.mxu0  ;;  %v417_v19 = vpop.f32.mrf.mxu1  ;;  %v303_v30 = vadd.f32 %v302_v8, %v2304_v44  ;;  %v416_v31 = vadd.f32 %v415_v9, %v2306_v45 }
 0x103   :  { %v525_v20 = vpack.c.bf16 %v481_v14, %v477_v10  ;;  %v527_v21 = vpack.c.bf16 %v483_v15, %v479_v13  ;;  %v305_v24 = vadd.f32 %v304_v18, %v2298_v42  ;;  %v418_v27 = vadd.f32 %v417_v19, %v2300_v43 }
 0x104   :  { %v306_v25 = vpop.f32.mrf.mxu0  ;;  %v419_v26 = vpop.f32.mrf.mxu1  ;;  %v484_v48 = vmax.f32 %v303_v30, 0.0  ;;  %v486_v49 = vmax.f32 %v416_v31, 0.0 }
 0x105   :  { %v307_v28 = vadd.f32 %v306_v25, %v2304_v44  ;;  %v420_v29 = vadd.f32 %v419_v26, %v2306_v45  ;;  %1171 = vmatprep.mubr.bf16.mxu1 %v525_v20  ;;  %1284 = vmatprep.mubr.bf16.mxu0 %v527_v21  ;;  %v485_v40 = vmax.f32 %v305_v24, 0.0  ;;  %v487_v41 = vmax.f32 %v418_v27, 0.0 }
 0x106   :  { %v308_v32 = vpop.f32.mrf.mxu0  ;;  %v421_v33 = vpop.f32.mrf.mxu1  ;;  %1172 = vmatmul.mubr.bf16.gmra.mxu1 %v524_v22  ;;  %1285 = vmatmul.mubr.bf16.gmra.mxu0 %v526_v23 }
 0x107   :  { %v309_v0 = vadd.f32 %v308_v32, %v2298_v42  ;;  %v422_v34 = vadd.f32 %v421_v33, %v2300_v43  ;;  %v488_v35 = vmax.f32 %v307_v28, 0.0  ;;  %v490_v12 = vmax.f32 %v420_v29, 0.0 }
 0x108   :  { %v312_v38 = vpop.f32.mrf.mxu0  ;;  %v425_v39 = vpop.f32.mrf.mxu1 }
 0x109   :  { %v489_v46 = vmax.f32 %v309_v0, 0.0  ;;  %v491_v47 = vmax.f32 %v422_v34, 0.0  ;;  %v528_v54 = vpack.c.bf16 %v488_v35, %v484_v48  ;;  %v530_v55 = vpack.c.bf16 %v490_v12, %v486_v49 }
 0x10a   :  { %v314_v50 = vpop.f32.mrf.mxu0  ;;  %v427_v51 = vpop.f32.mrf.mxu1  ;;  %v313_v62 = vadd.f32 %v312_v38, %v2304_v44  ;;  %v426_v63 = vadd.f32 %v425_v39, %v2306_v45 }
 0x10b   :  { %v529_v52 = vpack.c.bf16 %v489_v46, %v485_v40  ;;  %v531_v53 = vpack.c.bf16 %v491_v47, %v487_v41  ;;  %v315_v56 = vadd.f32 %v314_v50, %v2298_v42  ;;  %v428_v59 = vadd.f32 %v427_v51, %v2300_v43  ;;  %v1979_v50 = vld [vmem:[%s2629_s9 + $0x8] sm:$0xff]  }
 0x10c   :  { %v316_v57 = vpop.f32.mrf.mxu0  ;;  %v429_v58 = vpop.f32.mrf.mxu1  ;;  %v492_v15 = vmax.f32 %v313_v62, 0.0  ;;  %v494_v16 = vmax.f32 %v426_v63, 0.0 }
 0x10d   :  { %v317_v60 = vadd.f32 %v316_v57, %v2304_v44  ;;  %v430_v61 = vadd.f32 %v429_v58, %v2306_v45  ;;  %1181 = vmatprep.mubr.bf16.mxu1 %v529_v52  ;;  %1294 = vmatprep.mubr.bf16.mxu0 %v531_v53  ;;  %v493_v9 = vmax.f32 %v315_v56, 0.0  ;;  %v495_v10 = vmax.f32 %v428_v59, 0.0  ;;  %v1980_v52 = vld [vmem:[%s2629_s9 + $0x40] sm:$0xff]  }
 0x10e   :  { %v318_v1 = vpop.f32.mrf.mxu0  ;;  %v431_v2 = vpop.f32.mrf.mxu1  ;;  %1182 = vmatmul.mubr.bf16.gmra.mxu1 %v528_v54  ;;  %1295 = vmatmul.mubr.bf16.gmra.mxu0 %v530_v55  ;;  %v1981_v54 = vld [vmem:[%s2629_s9] sm:$0xff]  }
 0x10f   :  { %v319_v3 = vadd.f32 %v318_v1, %v2298_v42  ;;  %v432_v4 = vadd.f32 %v431_v2, %v2300_v43  ;;  %v496_v5 = vmax.f32 %v317_v60, 0.0  ;;  %v498_v6 = vmax.f32 %v430_v61, 0.0 }
 0x110   :  { %v322_v7 = vpop.f32.mrf.mxu0  ;;  %v435_v8 = vpop.f32.mrf.mxu1 }
 0x111   :  { %v497_v13 = vmax.f32 %v319_v3, 0.0  ;;  %v499_v14 = vmax.f32 %v432_v4, 0.0  ;;  %v532_v21 = vpack.c.bf16 %v496_v5, %v492_v15  ;;  %v534_v22 = vpack.c.bf16 %v498_v6, %v494_v16 }
 0x112   :  { %v324_v17 = vpop.f32.mrf.mxu0  ;;  %v437_v18 = vpop.f32.mrf.mxu1  ;;  %v323_v29 = vadd.f32 %v322_v7, %v2304_v44  ;;  %v436_v30 = vadd.f32 %v435_v8, %v2306_v45 }
 0x113   :  { %v533_v19 = vpack.c.bf16 %v497_v13, %v493_v9  ;;  %v535_v20 = vpack.c.bf16 %v499_v14, %v495_v10  ;;  %v325_v23 = vadd.f32 %v324_v17, %v2298_v42  ;;  %v438_v26 = vadd.f32 %v437_v18, %v2300_v43 }
 0x114   :  { %v326_v24 = vpop.f32.mrf.mxu0  ;;  %v439_v25 = vpop.f32.mrf.mxu1  ;;  %v500_v41 = vmax.f32 %v323_v29, 0.0  ;;  %v502_v46 = vmax.f32 %v436_v30, 0.0 }
 0x115   :  { %v327_v27 = vadd.f32 %v326_v24, %v2304_v44  ;;  %v440_v28 = vadd.f32 %v439_v25, %v2306_v45  ;;  %1191 = vmatprep.mubr.bf16.mxu1 %v533_v19  ;;  %1304 = vmatprep.mubr.bf16.mxu0 %v535_v20  ;;  %v501_v12 = vmax.f32 %v325_v23, 0.0  ;;  %v503_v38 = vmax.f32 %v438_v26, 0.0 }
 0x116   :  { %v328_v31 = vpop.f32.mrf.mxu0  ;;  %v441_v32 = vpop.f32.mrf.mxu1  ;;  %1192 = vmatmul.mubr.bf16.gmra.mxu1 %v532_v21  ;;  %1305 = vmatmul.mubr.bf16.gmra.mxu0 %v534_v22 }
 0x117   :  { %v329_v33 = vadd.f32 %v328_v31, %v2298_v42  ;;  %v442_v0 = vadd.f32 %v441_v32, %v2300_v43  ;;  %v504_v34 = vmax.f32 %v327_v27, 0.0  ;;  %v506_v35 = vmax.f32 %v440_v28, 0.0  ;;  %v1978_v43 = vld [vmem:[%s2629_s9 + $0x48] sm:$0xff]   ;;  %v1325_v27 = vld [vmem:[%s2628_s8] sm:$0x3] }
 0x118   :  { %v700_v49 = vpop.f32.mrf.mxu0  ;;  %1800 = vmatprep.subr.bf16.mxu1 %v1978_v43  ;;  %v2472_v32 = vrot.slane %v1325_v27, %v139_v11 }
 0x119   :  { %v505_v39 = vmax.f32 %v329_v33, 0.0  ;;  %v507_v40 = vmax.f32 %v442_v0, 0.0  ;;  %v536_v48 = vpack.c.bf16 %v504_v34, %v500_v41  ;;  %v538_v45 = vpack.c.bf16 %v506_v35, %v502_v46  ;;  %1801 = vmatpush3.bf16.msra.mxu1 %v1979_v50 }
 0x11a   :  { %v702_v42 = vpop.f32.mrf.mxu0  ;;  %1802 = vmatprep.subr.bf16.mxu1 %v1980_v52  ;;  %v2476_v34 = vrot.slane %v1325_v27, %v135_v37 }
 0x11b   :  { %v537_v47 = vpack.c.bf16 %v505_v39, %v501_v12  ;;  %v539_v44 = vpack.c.bf16 %v507_v40, %v503_v38 }
 0x11c   :  { %v704_v51 = vpop.f32.mrf.mxu0 }
 0x11d   :  { %1201 = vmatprep.mubr.bf16.mxu1 %v537_v47  ;;  %1314 = vmatprep.mubr.bf16.mxu0 %v539_v44 }
 0x11e   :  { %1202 = vmatmul.mubr.bf16.gmra.mxu1 %v536_v48  ;;  %1315 = vmatmul.mubr.bf16.gmra.mxu0 %v538_v45  ;;  %v706_v53 = vpop.f32.mrf.mxu0 }
 0x11f   :  { %1803 = vmatpush3.bf16.msra.mxu1 %v1981_v54 }
 0x120   :  { %v710_v55 = vpop.f32.mrf.mxu0 }
 0x122   :  { %v712_v56 = vpop.f32.mrf.mxu0 }
 0x124   :  { %v714_v57 = vpop.f32.mrf.mxu0 }
 0x126   :  { %v2417_v58 = vpop.f32.mrf.mxu0 }
 0x128   :  { %v2419_v59 = vpop.f32.mrf.mxu0 }
 0x12a   :  { %v2421_v60 = vpop.f32.mrf.mxu0 }
 0x12c   :  { %v2423_v61 = vpop.f32.mrf.mxu0 }
 0x12e   :  { %v2425_v62 = vpop.f32.mrf.mxu0 }
 0x130   :  { %v2427_v63 = vpop.f32.mrf.mxu0 }
 0x132   :  { %v2429_v1 = vpop.f32.mrf.mxu0 }
 0x134   :  { %v2431_v2 = vpop.f32.mrf.mxu0 }
 0x136   :  { %v2433_v3 = vpop.f32.mrf.mxu0 }
 0x138   :  { %v2435_v4 = vpop.f32.mrf.mxu0 }
 0x13a   :  { %v2437_v5 = vpop.f32.mrf.mxu0 }
 0x13c   :  { %v2439_v6 = vpop.f32.mrf.mxu0 }
 0x13e   :  { %v2441_v7 = vpop.f32.mrf.mxu0 }
 0x140   :  { %v2443_v8 = vpop.f32.mrf.mxu0 }
 0x142   :  { %v2445_v9 = vpop.f32.mrf.mxu0 }
 0x144   :  { %v2447_v10 = vpop.f32.mrf.mxu0 }
 0x146   :  { %v2449_v13 = vpop.f32.mrf.mxu0 }
 0x148   :  { %v2451_v14 = vpop.f32.mrf.mxu0 }
 0x14a   :  { %v2453_v15 = vpop.f32.mrf.mxu0 }
 0x14c   :  { %v2455_v16 = vpop.f32.mrf.mxu0 }
 0x14e   :  { %v2457_v17 = vpop.f32.mrf.mxu0 }
 0x150   :  { %v2459_v18 = vpop.f32.mrf.mxu0 }
 0x152   :  { %v2461_v19 = vpop.f32.mrf.mxu0 }
 0x154   :  { %v2463_v20 = vpop.f32.mrf.mxu0 }
 0x156   :  { %v2465_v21 = vpop.f32.mrf.mxu0 }
 0x1a6   :  { %v1133_v22 = vpop.f32.mrf.mxu1  ;;  %v1246_v23 = vpop.f32.mrf.mxu0 }
 0x1a7   :  { %v1134_v24 = vadd.f32 %v1133_v22, %v700_v49 }
 0x1a8   :  { %v1135_v25 = vpop.f32.mrf.mxu1  ;;  %v1248_v26 = vpop.f32.mrf.mxu0 }
 0x1a9   :  { %v1136_v28 = vadd.f32 %v1135_v25, %v702_v42  ;;  %v1247_v0 = vadd.f32 %v1246_v23, %v1134_v24 }
 0x1aa   :  { %v1137_v29 = vpop.f32.mrf.mxu1  ;;  %v1250_v30 = vpop.f32.mrf.mxu0 }
 0x1ab   :  { %v1249_v31 = vadd.f32 %v1248_v26, %v1136_v28  ;;  %v1138_v33 = vadd.f32 %v1137_v29, %v704_v51  ;;  %v1337_v11 = vadd.f32 %v2476_v34, %v1247_v0 }
 0x1ac   :  { %v1139_v35 = vpop.f32.mrf.mxu1  ;;  %v1252_v12 = vpop.f32.mrf.mxu0 }
 0x1ad   :  { %v1251_v38 = vadd.f32 %v1250_v30, %v1138_v33  ;;  %v1140_v39 = vadd.f32 %v1139_v35, %v706_v53  ;;  %v1338_v46 = vadd.f32 %v2472_v32, %v1249_v31  ;;  %v1369_v53 = vmax.f32 %v1337_v11, 0.0 }
 0x1ae   :  { %v1143_v40 = vpop.f32.mrf.mxu1  ;;  %v1256_v41 = vpop.f32.mrf.mxu0 }
 0x1af   :  { %v1339_v47 = vadd.f32 %v2476_v34, %v1251_v38  ;;  %v1253_v44 = vadd.f32 %v1252_v12, %v1140_v39  ;;  %v1144_v36 = vadd.f32 %v1143_v40, %v710_v55  ;;  %v1370_v51 = vmax.f32 %v1338_v46, 0.0 }
 0x1b0   :  { %v1145_v48 = vpop.f32.mrf.mxu1  ;;  %v1258_v45 = vpop.f32.mrf.mxu0 }
 0x1b1   :  { %v1340_v49 = vadd.f32 %v2472_v32, %v1253_v44  ;;  %v1146_v37 = vadd.f32 %v1145_v48, %v712_v56  ;;  %v1371_v42 = vmax.f32 %v1339_v47, 0.0  ;;  %v1257_v25 = vadd.f32 %v1256_v41, %v1144_v36 }
 0x1b2   :  { %v1147_v43 = vpop.f32.mrf.mxu1  ;;  %v1260_v50 = vpop.f32.mrf.mxu0 }
 0x1b3   :  { %v1372_v52 = vmax.f32 %v1340_v49, 0.0  ;;  %v1259_v54 = vadd.f32 %v1258_v45, %v1146_v37  ;;  %v1148_v22 = vadd.f32 %v1147_v43, %v714_v57  ;;  %v1401_v28 = vpack.c.bf16 %v1371_v42, %v1369_v53 }
 0x1b4   :  { %v1149_v23 = vpop.f32.mrf.mxu1  ;;  %v1262_v24 = vpop.f32.mrf.mxu0  ;;  %v1341_v57 = vadd.f32 %v2476_v34, %v1257_v25 }
 0x1b5   :  { %v1150_v26 = vadd.f32 %v1149_v23, %v2417_v58  ;;  %v1402_v27 = vpack.c.bf16 %v1372_v52, %v1370_v51  ;;  %v1261_v29 = vadd.f32 %v1260_v50, %v1148_v22  ;;  %v1342_v56 = vadd.f32 %v2472_v32, %v1259_v54 }
 0x1b6   :  { %v1153_v30 = vpop.f32.mrf.mxu1  ;;  %v1266_v31 = vpop.f32.mrf.mxu0  ;;  %v1373_v49 = vmax.f32 %v1341_v57, 0.0 }
 0x1b7   :  { %v1263_v55 = vadd.f32 %v1262_v24, %v1150_v26  ;;  %1584 = vmatprep.mubr.bf16.mxu1 %v1402_v27  ;;  %v1343_v33 = vadd.f32 %v2476_v34, %v1261_v29  ;;  %v1154_v58 = vadd.f32 %v1153_v30, %v2419_v59  ;;  %v1374_v44 = vmax.f32 %v1342_v56, 0.0 }
 0x1b8   :  { %v1155_v0 = vpop.f32.mrf.mxu1  ;;  %v1268_v35 = vpop.f32.mrf.mxu0  ;;  %1585 = vmatmul.mubr.bf16.vlgmr.msra.gmra.mxu1 %v1401_v28 }
 0x1b9   :  { %v1344_v12 = vadd.f32 %v2472_v32, %v1263_v55  ;;  %v1156_v38 = vadd.f32 %v1155_v0, %v2421_v60  ;;  %v1375_v41 = vmax.f32 %v1343_v33, 0.0  ;;  %v1267_v36 = vadd.f32 %v1266_v31, %v1154_v58 }
 0x1ba   :  { %v1157_v39 = vpop.f32.mrf.mxu1  ;;  %v1270_v40 = vpop.f32.mrf.mxu0 }
 0x1bb   :  { %v1376_v46 = vmax.f32 %v1344_v12, 0.0  ;;  %v1158_v47 = vadd.f32 %v1157_v39, %v2423_v61  ;;  %v1269_v11 = vadd.f32 %v1268_v35, %v1156_v38  ;;  %v1403_v52 = vpack.c.bf16 %v1375_v41, %v1373_v49 }
 0x1bc   :  { %v1159_v48 = vpop.f32.mrf.mxu1  ;;  %v1272_v45 = vpop.f32.mrf.mxu0  ;;  %v1345_v22 = vadd.f32 %v2476_v34, %v1267_v36 }
 0x1bd   :  { %v1271_v37 = vadd.f32 %v1270_v40, %v1158_v47  ;;  %v1160_v42 = vadd.f32 %v1159_v48, %v2425_v62  ;;  %v1404_v59 = vpack.c.bf16 %v1376_v46, %v1374_v44  ;;  %v1346_v53 = vadd.f32 %v2472_v32, %v1269_v11 }
 0x1be   :  { %v1163_v43 = vpop.f32.mrf.mxu1  ;;  %v1276_v50 = vpop.f32.mrf.mxu0  ;;  %v1377_v33 = vmax.f32 %v1345_v22, 0.0 }
 0x1bf   :  { %v1347_v60 = vadd.f32 %v2476_v34, %v1271_v37  ;;  %v1273_v51 = vadd.f32 %v1272_v45, %v1160_v42  ;;  %1592 = vmatprep.mubr.bf16.mxu1 %v1404_v59  ;;  %v1164_v24 = vadd.f32 %v1163_v43, %v2427_v63  ;;  %v1378_v30 = vmax.f32 %v1346_v53, 0.0 }
 0x1c0   :  { %v1165_v61 = vpop.f32.mrf.mxu1  ;;  %v1278_v54 = vpop.f32.mrf.mxu0  ;;  %1593 = vmatmul.mubr.bf16.gmra.mxu1 %v1403_v52 }
 0x1c1   :  { %v1348_v23 = vadd.f32 %v2472_v32, %v1273_v51  ;;  %v1166_v62 = vadd.f32 %v1165_v61, %v2429_v1  ;;  %v1379_v27 = vmax.f32 %v1347_v60, 0.0  ;;  %v1277_v0 = vadd.f32 %v1276_v50, %v1164_v24 }
 0x1c2   :  { %v1167_v25 = vpop.f32.mrf.mxu1  ;;  %v1280_v26 = vpop.f32.mrf.mxu0 }
 0x1c3   :  { %v1380_v28 = vmax.f32 %v1348_v23, 0.0  ;;  %v1168_v29 = vadd.f32 %v1167_v25, %v2431_v2  ;;  %v1279_v31 = vadd.f32 %v1278_v54, %v1166_v62  ;;  %v1405_v39 = vpack.c.bf16 %v1379_v27, %v1377_v33 }
 0x1c4   :  { %v1169_v55 = vpop.f32.mrf.mxu1  ;;  %v1282_v56 = vpop.f32.mrf.mxu0  ;;  %v1349_v46 = vadd.f32 %v2476_v34, %v1277_v0 }
 0x1c5   :  { %v1281_v35 = vadd.f32 %v1280_v26, %v1168_v29  ;;  %v1170_v57 = vadd.f32 %v1169_v55, %v2433_v3  ;;  %v1406_v58 = vpack.c.bf16 %v1380_v28, %v1378_v30  ;;  %v1350_v40 = vadd.f32 %v2472_v32, %v1279_v31 }
 0x1c6   :  { %v1173_v12 = vpop.f32.mrf.mxu1  ;;  %v1286_v63 = vpop.f32.mrf.mxu0  ;;  %v1381_v59 = vmax.f32 %v1349_v46, 0.0 }
 0x1c7   :  { %v1351_v1 = vadd.f32 %v2476_v34, %v1281_v35  ;;  %v1283_v38 = vadd.f32 %v1282_v56, %v1170_v57  ;;  %1600 = vmatprep.mubr.bf16.mxu1 %v1406_v58  ;;  %v1174_v44 = vadd.f32 %v1173_v12, %v2435_v4  ;;  %v1382_v37 = vmax.f32 %v1350_v40, 0.0 }
 0x1c8   :  { %v1175_v2 = vpop.f32.mrf.mxu1  ;;  %v1288_v41 = vpop.f32.mrf.mxu0  ;;  %1601 = vmatmul.mubr.bf16.gmra.mxu1 %v1405_v39 }
 0x1c9   :  { %v1352_v47 = vadd.f32 %v2472_v32, %v1283_v38  ;;  %v1176_v3 = vadd.f32 %v1175_v2, %v2437_v5  ;;  %v1383_v45 = vmax.f32 %v1351_v1, 0.0  ;;  %v1287_v60 = vadd.f32 %v1286_v63, %v1174_v44 }
 0x1ca   :  { %v1177_v11 = vpop.f32.mrf.mxu1  ;;  %v1290_v48 = vpop.f32.mrf.mxu0 }
 0x1cb   :  { %v1384_v49 = vmax.f32 %v1352_v47, 0.0  ;;  %v1178_v36 = vadd.f32 %v1177_v11, %v2439_v6  ;;  %v1289_v42 = vadd.f32 %v1288_v41, %v1176_v3  ;;  %v1407_v22 = vpack.c.bf16 %v1383_v45, %v1381_v59 }
 0x1cc   :  { %v1179_v43 = vpop.f32.mrf.mxu1  ;;  %v1292_v50 = vpop.f32.mrf.mxu0  ;;  %v1353_v62 = vadd.f32 %v2476_v34, %v1287_v60 }
 0x1cd   :  { %v1291_v51 = vadd.f32 %v1290_v48, %v1178_v36  ;;  %v1180_v52 = vadd.f32 %v1179_v43, %v2441_v7  ;;  %v1408_v61 = vpack.c.bf16 %v1384_v49, %v1382_v37  ;;  %v1354_v23 = vadd.f32 %v2472_v32, %v1289_v42 }
 0x1ce   :  { %v1183_v53 = vpop.f32.mrf.mxu1  ;;  %v1296_v4 = vpop.f32.mrf.mxu0  ;;  %v1385_v35 = vmax.f32 %v1353_v62, 0.0 }
 0x1cf   :  { %v1355_v5 = vadd.f32 %v2476_v34, %v1291_v51  ;;  %v1293_v54 = vadd.f32 %v1292_v50, %v1180_v52  ;;  %1608 = vmatprep.mubr.bf16.mxu1 %v1408_v61  ;;  %v1184_v26 = vadd.f32 %v1183_v53, %v2443_v8  ;;  %v1386_v55 = vmax.f32 %v1354_v23, 0.0 }
 0x1d0   :  { %v1185_v6 = vpop.f32.mrf.mxu1  ;;  %v1298_v24 = vpop.f32.mrf.mxu0  ;;  %1609 = vmatmul.mubr.bf16.gmra.mxu1 %v1407_v22 }
 0x1d1   :  { %v1356_v25 = vadd.f32 %v2472_v32, %v1293_v54  ;;  %v1186_v7 = vadd.f32 %v1185_v6, %v2445_v9  ;;  %v1387_v29 = vmax.f32 %v1355_v5, 0.0  ;;  %v1297_v57 = vadd.f32 %v1296_v4, %v1184_v26 }
 0x1d2   :  { %v1187_v27 = vpop.f32.mrf.mxu1  ;;  %v1300_v28 = vpop.f32.mrf.mxu0 }
 0x1d3   :  { %v1388_v30 = vmax.f32 %v1356_v25, 0.0  ;;  %v1188_v31 = vadd.f32 %v1187_v27, %v2447_v10  ;;  %v1299_v56 = vadd.f32 %v1298_v24, %v1186_v7  ;;  %v1409_v39 = vpack.c.bf16 %v1387_v29, %v1385_v35 }
 0x1d4   :  { %v1189_v33 = vpop.f32.mrf.mxu1  ;;  %v1302_v0 = vpop.f32.mrf.mxu0  ;;  %v1357_v41 = vadd.f32 %v2476_v34, %v1297_v57 }
 0x1d5   :  { %v1301_v12 = vadd.f32 %v1300_v28, %v1188_v31  ;;  %v1190_v63 = vadd.f32 %v1189_v33, %v2449_v13  ;;  %v1410_v1 = vpack.c.bf16 %v1388_v30, %v1386_v55  ;;  %v1358_v40 = vadd.f32 %v2472_v32, %v1299_v56 }
 0x1d6   :  { %v1193_v58 = vpop.f32.mrf.mxu1  ;;  %v1306_v8 = vpop.f32.mrf.mxu0  ;;  %v1389_v43 = vmax.f32 %v1357_v41, 0.0 }
 0x1d7   :  { %v1359_v9 = vadd.f32 %v2476_v34, %v1301_v12  ;;  %v1303_v38 = vadd.f32 %v1302_v0, %v1190_v63  ;;  %1616 = vmatprep.mubr.bf16.mxu1 %v1410_v1  ;;  %v1194_v47 = vadd.f32 %v1193_v58, %v2451_v14  ;;  %v1390_v49 = vmax.f32 %v1358_v40, 0.0 }
 0x1d8   :  { %v1195_v10 = vpop.f32.mrf.mxu1  ;;  %v1308_v2 = vpop.f32.mrf.mxu0  ;;  %1617 = vmatmul.mubr.bf16.gmra.mxu1 %v1409_v39 }
 0x1d9   :  { %v1360_v46 = vadd.f32 %v2472_v32, %v1303_v38  ;;  %v1196_v13 = vadd.f32 %v1195_v10, %v2453_v15  ;;  %v1391_v11 = vmax.f32 %v1359_v9, 0.0  ;;  %v1307_v50 = vadd.f32 %v1306_v8, %v1194_v47  ;;  %v2538_v38 = vld [vmem:[%s2630_s10] ss:$0 sm:$0xff] }
 0x1da   :  { %v1197_v44 = vpop.f32.mrf.mxu1  ;;  %v1310_v3 = vpop.f32.mrf.mxu0 }
 0x1db   :  { %v1392_v48 = vmax.f32 %v1360_v46, 0.0  ;;  %v1198_v45 = vadd.f32 %v1197_v44, %v2455_v16  ;;  %v1309_v36 = vadd.f32 %v1308_v2, %v1196_v13  ;;  %v1411_v4 = vpack.c.bf16 %v1391_v11, %v1389_v43 }
 0x1dc   :  { %v1199_v37 = vpop.f32.mrf.mxu1  ;;  %v1312_v42 = vpop.f32.mrf.mxu0  ;;  %v1361_v54 = vadd.f32 %v2476_v34, %v1307_v50 }
 0x1dd   :  { %v1311_v59 = vadd.f32 %v1310_v3, %v1198_v45  ;;  %v1200_v60 = vadd.f32 %v1199_v37, %v2457_v17  ;;  %v1412_v52 = vpack.c.bf16 %v1392_v48, %v1390_v49  ;;  %v1362_v61 = vadd.f32 %v2472_v32, %v1309_v36 }
 0x1de   :  { %v1203_v51 = vpop.f32.mrf.mxu1  ;;  %v1316_v14 = vpop.f32.mrf.mxu0  ;;  %v1393_v29 = vmax.f32 %v1361_v54, 0.0 }
 0x1df   :  { %v1363_v15 = vadd.f32 %v2476_v34, %v1311_v59  ;;  %v1313_v53 = vadd.f32 %v1312_v42, %v1200_v60  ;;  %1624 = vmatprep.mubr.bf16.mxu1 %v1412_v52  ;;  %v1204_v23 = vadd.f32 %v1203_v51, %v2459_v18  ;;  %v1394_v27 = vmax.f32 %v1362_v61, 0.0 }
 0x1e0   :  { %v1205_v16 = vpop.f32.mrf.mxu1  ;;  %v1318_v5 = vpop.f32.mrf.mxu0  ;;  %1625 = vmatmul.mubr.bf16.gmra.mxu1 %v1411_v4 }
 0x1e1   :  { %v1364_v22 = vadd.f32 %v2472_v32, %v1313_v53  ;;  %v1206_v17 = vadd.f32 %v1205_v16, %v2461_v19  ;;  %v1395_v62 = vmax.f32 %v1363_v15, 0.0  ;;  %v1317_v30 = vadd.f32 %v1316_v14, %v1204_v23 }
 0x1e2   :  { %v1207_v6 = vpop.f32.mrf.mxu1  ;;  %v1320_v24 = vpop.f32.mrf.mxu0 }
 0x1e3   :  { %v1396_v25 = vmax.f32 %v1364_v22, 0.0  ;;  %v1319_v26 = vadd.f32 %v1318_v5, %v1206_v17  ;;  %v1208_v7 = vadd.f32 %v1207_v6, %v2463_v20  ;;  %v1413_v35 = vpack.c.bf16 %v1395_v62, %v1393_v29 }
 0x1e4   :  { %v1209_v28 = vpop.f32.mrf.mxu1  ;;  %v1322_v56 = vpop.f32.mrf.mxu0  ;;  %v1365_v57 = vadd.f32 %v2476_v34, %v1317_v30 }
 0x1e5   :  { %v1321_v31 = vadd.f32 %v1320_v24, %v1208_v7  ;;  %v1210_v55 = vadd.f32 %v1209_v28, %v2465_v21  ;;  %v1414_v33 = vpack.c.bf16 %v1396_v25, %v1394_v27  ;;  %v1366_v18 = vadd.f32 %v2472_v32, %v1319_v26 }
 0x1e6   :  { %v1397_v8 = vmax.f32 %v1365_v57, 0.0 }
 0x1e7   :  { %v1367_v19 = vadd.f32 %v2476_v34, %v1321_v31  ;;  %v1323_v0 = vadd.f32 %v1322_v56, %v1210_v55  ;;  %1632 = vmatprep.mubr.bf16.mxu1 %v1414_v33  ;;  %v1398_v12 = vmax.f32 %v1366_v18, 0.0 }
 0x1e8   :  { %1633 = vmatmul.mubr.bf16.gmra.mxu1 %v1413_v35 }
 0x1e9   :  { %v1368_v20 = vadd.f32 %v2472_v32, %v1323_v0  ;;  %v1399_v63 = vmax.f32 %v1367_v19, 0.0 }
 0x1eb   :  { %v1400_v58 = vmax.f32 %v1368_v20, 0.0  ;;  %v1415_v21 = vpack.c.bf16 %v1399_v63, %v1397_v8 }
 0x1ed   :  { %v1416_v1 = vpack.c.bf16 %v1400_v58, %v1398_v12 }
 0x1ef   :  { %1640 = vmatprep.mubr.bf16.mxu1 %v1416_v1 }
 0x1f0   :  { %1641 = vmatmul.mubr.bf16.gmra.mxu1 %v1415_v21 }
 0x278   :  { %v1804_v9 = vpop.f32.mrf.mxu1 }
 0x27a   :  { %v1805_v39 = vpop.f32.mrf.mxu1 }
 0x27b   :  { %v1806_v40 = vadd.f32 %v1805_v39, %v1804_v9 }
 0x27c   :  { %v1807_v34 = vpop.f32.mrf.mxu1 }
 0x27d   :  { %v1587_v32 = vadd.f32 %v1806_v40, %v2538_v38 }
 0x27e   :  { %v1808_v10 = vpop.f32.mrf.mxu1 }
 0x27f   :  { %1649 = vst.msk [vmem:[%s2631_s11] sm:$0xff] %vm634_vm2, %v1587_v32  ;;  %v1809_v2 = vadd.f32 %v1808_v10, %v1807_v34 }
 0x280   :  { %v1810_v46 = vpop.f32.mrf.mxu1 }
 0x281   :  { %v1590_v41 = vadd.f32 %v1809_v2, %v2538_v38 }
 0x282   :  { %v1811_v47 = vpop.f32.mrf.mxu1 }
 0x283   :  { %1650 = vst.msk [vmem:[%s2631_s11 + $0x8] sm:$0xff] %vm634_vm2, %v1590_v41  ;;  %v1812_v13 = vadd.f32 %v1811_v47, %v1810_v46 }
 0x284   :  { %v1813_v44 = vpop.f32.mrf.mxu1 }
 0x285   :  { %v1595_v3 = vadd.f32 %v1812_v13, %v2538_v38 }
 0x286   :  { %v1814_v11 = vpop.f32.mrf.mxu1 }
 0x287   :  { %1651 = vst.msk [vmem:[%s2631_s11 + $0x10] sm:$0xff] %vm634_vm2, %v1595_v3  ;;  %v1815_v48 = vadd.f32 %v1814_v11, %v1813_v44 }
 0x288   :  { %v1816_v45 = vpop.f32.mrf.mxu1 }
 0x289   :  { %v1598_v49 = vadd.f32 %v1815_v48, %v2538_v38 }
 0x28a   :  { %v1817_v36 = vpop.f32.mrf.mxu1 }
 0x28b   :  { %1652 = vst.msk [vmem:[%s2631_s11 + $0x18] sm:$0xff] %vm634_vm2, %v1598_v49  ;;  %v1818_v37 = vadd.f32 %v1817_v36, %v1816_v45 }
 0x28c   :  { %v1819_v42 = vpop.f32.mrf.mxu1 }
 0x28d   :  { %v1603_v43 = vadd.f32 %v1818_v37, %v2538_v38 }
 0x28e   :  { %v1820_v50 = vpop.f32.mrf.mxu1 }
 0x28f   :  { %1653 = vst.msk [vmem:[%s2631_s11 + $0x20] sm:$0xff] %vm634_vm2, %v1603_v43  ;;  %v1821_v59 = vadd.f32 %v1820_v50, %v1819_v42 }
 0x290   :  { %v1822_v60 = vpop.f32.mrf.mxu1 }
 0x291   :  { %v1606_v51 = vadd.f32 %v1821_v59, %v2538_v38 }
 0x292   :  { %v1823_v14 = vpop.f32.mrf.mxu1 }
 0x293   :  { %1654 = vst.msk [vmem:[%s2631_s11 + $0x28] sm:$0xff] %vm634_vm2, %v1606_v51  ;;  %v1824_v52 = vadd.f32 %v1823_v14, %v1822_v60 }
 0x294   :  { %v1825_v15 = vpop.f32.mrf.mxu1 }
 0x295   :  { %v1611_v53 = vadd.f32 %v1824_v52, %v2538_v38 }
 0x296   :  { %v1826_v4 = vpop.f32.mrf.mxu1 }
 0x297   :  { %1655 = vst.msk [vmem:[%s2631_s11 + $0x30] sm:$0xff] %vm634_vm2, %v1611_v53  ;;  %v1827_v61 = vadd.f32 %v1826_v4, %v1825_v15 }
 0x298   :  { %v1828_v16 = vpop.f32.mrf.mxu1 }
 0x299   :  { %v1614_v5 = vadd.f32 %v1827_v61, %v2538_v38 }
 0x29a   :  { %v1829_v54 = vpop.f32.mrf.mxu1 }
 0x29b   :  { %1656 = vst.msk [vmem:[%s2631_s11 + $0x38] sm:$0xff] %vm634_vm2, %v1614_v5  ;;  %v1830_v22 = vadd.f32 %v1829_v54, %v1828_v16 }
 0x29c   :  { %v1831_v23 = vpop.f32.mrf.mxu1 }
 0x29d   :  { %v1619_v17 = vadd.f32 %v1830_v22, %v2538_v38 }
 0x29e   :  { %v1832_v6 = vpop.f32.mrf.mxu1 }
 0x29f   :  { %1657 = vst.msk [vmem:[%s2631_s11 + $0x40] sm:$0xff] %vm634_vm2, %v1619_v17  ;;  %v1833_v24 = vadd.f32 %v1832_v6, %v1831_v23 }
 0x2a0   :  { %v1834_v62 = vpop.f32.mrf.mxu1 }
 0x2a1   :  { %v1622_v25 = vadd.f32 %v1833_v24, %v2538_v38 }
 0x2a2   :  { %v1835_v26 = vpop.f32.mrf.mxu1 }
 0x2a3   :  { %1658 = vst.msk [vmem:[%s2631_s11 + $0x48] sm:$0xff] %vm634_vm2, %v1622_v25  ;;  %v1836_v7 = vadd.f32 %v1835_v26, %v1834_v62 }
 0x2a4   :  { %v1837_v27 = vpop.f32.mrf.mxu1 }
 0x2a5   :  { %v1627_v28 = vadd.f32 %v1836_v7, %v2538_v38 }
 0x2a6   :  { %v1838_v29 = vpop.f32.mrf.mxu1 }
 0x2a7   :  { %1659 = vst.msk [vmem:[%s2631_s11 + $0x50] sm:$0xff] %vm634_vm2, %v1627_v28  ;;  %v1839_v30 = vadd.f32 %v1838_v29, %v1837_v27 }
 0x2a8   :  { %v1840_v31 = vpop.f32.mrf.mxu1 }
 0x2a9   :  { %v1630_v55 = vadd.f32 %v1839_v30, %v2538_v38 }
 0x2aa   :  { %v1841_v56 = vpop.f32.mrf.mxu1 }
 0x2ab   :  { %1660 = vst.msk [vmem:[%s2631_s11 + $0x58] sm:$0xff] %vm634_vm2, %v1630_v55  ;;  %v1842_v33 = vadd.f32 %v1841_v56, %v1840_v31 }
 0x2ac   :  { %v1843_v18 = vpop.f32.mrf.mxu1 }
 0x2ad   :  { %v1635_v19 = vadd.f32 %v1842_v33, %v2538_v38 }
 0x2ae   :  { %v1844_v0 = vpop.f32.mrf.mxu1 }
 0x2af   :  { %1661 = vst.msk [vmem:[%s2631_s11 + $0x60] sm:$0xff] %vm634_vm2, %v1635_v19  ;;  %v1845_v35 = vadd.f32 %v1844_v0, %v1843_v18 }
 0x2b0   :  { %v1846_v57 = vpop.f32.mrf.mxu1 }
 0x2b1   :  { %v1638_v20 = vadd.f32 %v1845_v35, %v2538_v38 }
 0x2b2   :  { %v1847_v12 = vpop.f32.mrf.mxu1 }
 0x2b3   :  { %1662 = vst.msk [vmem:[%s2631_s11 + $0x68] sm:$0xff] %vm634_vm2, %v1638_v20  ;;  %v1848_v63 = vadd.f32 %v1847_v12, %v1846_v57 }
 0x2b4   :  { %v1849_v58 = vpop.f32.mrf.mxu1 }
 0x2b5   :  { %v1643_v8 = vadd.f32 %v1848_v63, %v2538_v38 }
 0x2b6   :  { %v1850_v1 = vpop.f32.mrf.mxu1 }
 0x2b7   :  { %1663 = vst.msk [vmem:[%s2631_s11 + $0x70] sm:$0xff] %vm634_vm2, %v1643_v8  ;;  %v1851_v21 = vadd.f32 %v1850_v1, %v1849_v58 }
 0x2b9   :  { %v1646_v9 = vadd.f32 %v1851_v21, %v2538_v38 }
 0x2bb   :  { %1664 = vst.msk [vmem:[%s2631_s11 + $0x78] sm:$0xff] %vm634_vm2, %v1646_v9 }
 0x2bc   :  { %1669 = vsyncpa [#allocation3], 1 }

</bundles_post_ra>
